<compile_context>
chip_gen: v7x
topology: tpu7x:2x2x1
jax: 0.10.0
libtpu: 0.0.40
codegen_flags: <defaults>
</compile_context>

<pallas_src>
import jax
import jax.numpy as jnp
from jax.experimental import pallas as pl
from jax.experimental.pallas import tpu as pltpu

IN_FEATURES = 44           # action_dim + state_dim + state_dim = 4 + 20 + 20
HIDDEN = IN_FEATURES * 4   # 176
LEAKY_SLOPE = 0.2


def _leaky_relu(x):
    # max(x, 0.2*x): one mul + one max (vs cmp + mul + select for where()).
    return jnp.maximum(x, LEAKY_SLOPE * x)


def _prep(t):
    """Mirror torch: squeeze all singleton dims, re-add a batch dim if 1-D."""
    t = jnp.squeeze(t)
    return t[None, :] if t.ndim == 1 else t


def _activation_dtype():
    """bf16 activations on chips with bf16 VALUs (v6e/v7x); f32 otherwise."""
    try:
        kind = jax.devices()[0].device_kind.lower()
    except Exception:
        return jnp.float32
    if "v6" in kind or "v7" in kind:
        return jnp.bfloat16
    return jnp.float32


def mlp_kernel(x_ref,
               w1_ref, b1_ref, w2_ref, b2_ref, w3_ref, b3_ref,
               w4_ref, b4_ref, w5_ref, b5_ref, w6_ref, b6_ref,
               out_ref):
    """One batch tile of the discriminator MLP.

    Layer 1: single bf16 MXU dot over the fused [tb, 44] trajectory tile.
    Layers 2-5: bf16 MXU operands, f32 accumulation, bias+LeakyReLU in the
                chip-appropriate activation dtype.
    Layer 6 (176 -> 1): VPU elementwise mul + XLU lane reduce, then Sigmoid.
    """
    f32 = jnp.float32
    act_dt = b1_ref.dtype          # bf16 on v6e/v7x, f32 on v5e

    h = jnp.dot(x_ref[...], w1_ref[...], preferred_element_type=f32)
    h = _leaky_relu(h.astype(act_dt) + b1_ref[...])

    for w_ref, b_ref in ((w2_ref, b2_ref), (w3_ref, b3_ref),
                         (w4_ref, b4_ref), (w5_ref, b5_ref)):
        h = jnp.dot(h.astype(jnp.bfloat16), w_ref[...],
                    preferred_element_type=f32)
        h = _leaky_relu(h.astype(act_dt) + b_ref[...])

    # Final Linear(176, 1) kept off the MXU.
    logits = jnp.sum(h.astype(f32) * w6_ref[...], axis=-1, keepdims=True)
    logits = logits + b6_ref[...]
    out_ref[...] = jax.nn.sigmoid(logits).astype(out_ref.dtype)


def init_params(key):
    """nn.Linear-shaped params. Weights stored [in, out]; biases [1, out]."""
    dims = [(IN_FEATURES, HIDDEN),
            (HIDDEN, HIDDEN),
            (HIDDEN, HIDDEN),
            (HIDDEN, HIDDEN),
            (HIDDEN, HIDDEN),
            (HIDDEN, 1)]
    params = []
    for fan_in, fan_out in dims:
        key, kw, kb = jax.random.split(key, 3)
        bound = 1.0 / jnp.sqrt(jnp.float32(fan_in))
        w = jax.random.uniform(kw, (fan_in, fan_out), jnp.float32, -bound, bound)
        b = jax.random.uniform(kb, (1, fan_out), jnp.float32, -bound, bound)
        params.append((w, b))
    return params


def _batch_tile(b):
    """Row tile: sublane-aligned, up to 1024 rows, and >=2 grid steps once
    B >= 256 so v7x's two TensorCores both get work via the parallel axis."""
    b8 = ((b + 7) // 8) * 8
    if b8 < 256:
        return b8                          # single small tile; grid = 1
    half = ((b8 + 15) // 16) * 8           # ceil(b8/2) rounded up to 8
    return min(1024, half)


def nonconv_discriminator_forward(states, actions, next_states, params):
    """Mirrors NonconvDiscriminator.forward:
        trajectories = cat((actions, states, next_states), -1)  -> [B, 44]
        probs = Sigmoid(MLP(trajectories))                      -> [B, 1]
    The concat / bf16 cast / padding happen once in the wrapper; the kernel
    sees a single fused [tb, 44] batch operand.
    """
    states = _prep(states)
    actions = _prep(actions)
    next_states = _prep(next_states)

    traj = jnp.concatenate((actions, states, next_states), axis=-1)
    B, feat = traj.shape
    assert feat == IN_FEATURES, feat

    tb = _batch_tile(B)
    grid = pl.cdiv(B, tb)
    b_pad = grid * tb
    pad = b_pad - B

    x = traj.astype(jnp.bfloat16)
    if pad:
        x = jnp.pad(x, ((0, pad), (0, 0)))

    act_dt = _activation_dtype()
    bf16 = jnp.bfloat16
    (w1, b1), (w2, b2), (w3, b3), (w4, b4), (w5, b5), (w6, b6) = params
    w1b, w2b, w3b, w4b, w5b = (w.astype(bf16) for w in (w1, w2, w3, w4, w5))
    b1a, b2a, b3a, b4a, b5a = (b.astype(act_dt) for b in (b1, b2, b3, b4, b5))
    w6_row = jnp.reshape(w6, (1, HIDDEN)).astype(jnp.float32)   # [1, 176]
    b6f = b6.astype(jnp.float32)                                # [1, 1]

    def batch_spec(f):
        return pl.BlockSpec((tb, f), lambda i: (i, 0))

    def const_spec(shape):
        # Same block every grid step -> DMA'd once, stays VMEM-resident.
        return pl.BlockSpec(shape, lambda i: (0, 0))

    out = pl.pallas_call(
        mlp_kernel,
        out_shape=jax.ShapeDtypeStruct((b_pad, 1), jnp.float32),
        grid=(grid,),
        in_specs=[
            batch_spec(IN_FEATURES),
            const_spec((IN_FEATURES, HIDDEN)), const_spec((1, HIDDEN)),
            const_spec((HIDDEN, HIDDEN)), const_spec((1, HIDDEN)),
            const_spec((HIDDEN, HIDDEN)), const_spec((1, HIDDEN)),
            const_spec((HIDDEN, HIDDEN)), const_spec((1, HIDDEN)),
            const_spec((HIDDEN, HIDDEN)), const_spec((1, HIDDEN)),
            const_spec((1, HIDDEN)), const_spec((1, 1)),
        ],
        out_specs=pl.BlockSpec((tb, 1), lambda i: (i, 0)),
        compiler_params=pltpu.CompilerParams(
            dimension_semantics=("parallel",)),
    )(x, w1b, b1a, w2b, b2a, w3b, b3a, w4b, b4a, w5b, b5a, w6_row, b6f)

    return out[:B]


def reference_forward_emulated(states, actions, next_states, params, act_dt):
    """Pure-JAX reference mirroring the kernel's mixed-precision math."""
    traj = jnp.concatenate(
        (_prep(actions), _prep(states), _prep(next_states)), axis=-1
    ).astype(jnp.bfloat16)
    f32 = jnp.float32
    h = traj
    for w, b in params[:-1]:
        h = jnp.dot(h.astype(jnp.bfloat16), w.astype(jnp.bfloat16),
                    preferred_element_type=f32)
        h = _leaky_relu(h.astype(act_dt) + b.astype(act_dt))
    w6, b6 = params[-1]
    logits = jnp.sum(h.astype(f32) * jnp.reshape(w6, (1, -1)).astype(f32),
                     axis=-1, keepdims=True) + b6.astype(f32)
    return jax.nn.sigmoid(logits)


def reference_forward_f32(states, actions, next_states, params):
    """Full-precision reference of the original torch module semantics."""
    traj = jnp.concatenate(
        (_prep(actions), _prep(states), _prep(next_states)), axis=-1
    ).astype(jnp.float32)
    h = traj
    for i, (w, b) in enumerate(params):
        h = h @ w + b
        if i < len(params) - 1:
            h = jnp.where(h > 0, h, LEAKY_SLOPE * h)
    return jax.nn.sigmoid(h)


if __name__ == "__main__":
    key = jax.random.PRNGKey(0)
    key, k_s, k_a, k_ns, k_p = jax.random.split(key, 5)

    # action_dim + state_dim + state_dim = 4 + 20 + 20 = 44 = in_features.
    # B=300 exercises the multi-step grid (2 tiles of 152) + the padding tail.
    B = 300
    state_dim = 20
    action_dim = 4

    states = jax.random.normal(k_s, (B, state_dim), jnp.float32)
    actions = jax.random.normal(k_a, (B, action_dim), jnp.float32)
    next_states = jax.random.normal(k_ns, (B, state_dim), jnp.float32)

    params = init_params(k_p)

    probs = nonconv_discriminator_forward(states, actions, next_states, params)
    probs = jax.block_until_ready(probs)
    assert probs.shape == (B, 1), probs.shape

    act_dt = _activation_dtype()
    ref_emu = reference_forward_emulated(states, actions, next_states, params, act_dt)
    assert jnp.allclose(probs, ref_emu, atol=2e-3, rtol=2e-3), (
        float(jnp.max(jnp.abs(probs - ref_emu))))

    ref_f32 = reference_forward_f32(states, actions, next_states, params)
    assert jnp.allclose(probs, ref_f32, atol=3e-2, rtol=3e-2), (
        float(jnp.max(jnp.abs(probs - ref_f32))))

    # Single-sample path: exercises the torch squeeze/unsqueeze semantics.
    p1 = nonconv_discriminator_forward(states[:1], actions[:1], next_states[:1], params)
    p1 = jax.block_until_ready(p1)
    assert p1.shape == (1, 1), p1.shape
    assert jnp.allclose(p1, probs[:1], atol=2e-3, rtol=2e-3)

    print("KERNEL_OK")
</pallas_src>

<mosaic_0001>
module attributes {stable_mosaic.version = 11 : i64} {
  func.func @mlp_kernel(%arg0: i32, %arg1: memref<152x44xbf16, #tpu.memory_space<vmem>>, %arg2: memref<44x176xbf16, #tpu.memory_space<vmem>>, %arg3: memref<1x176xf32, #tpu.memory_space<vmem>>, %arg4: memref<176x176xbf16, #tpu.memory_space<vmem>>, %arg5: memref<1x176xf32, #tpu.memory_space<vmem>>, %arg6: memref<176x176xbf16, #tpu.memory_space<vmem>>, %arg7: memref<1x176xf32, #tpu.memory_space<vmem>>, %arg8: memref<176x176xbf16, #tpu.memory_space<vmem>>, %arg9: memref<1x176xf32, #tpu.memory_space<vmem>>, %arg10: memref<176x176xbf16, #tpu.memory_space<vmem>>, %arg11: memref<1x176xf32, #tpu.memory_space<vmem>>, %arg12: memref<1x176xf32, #tpu.memory_space<vmem>>, %arg13: memref<1x1xf32, #tpu.memory_space<vmem>>, %arg14: memref<152x1xf32, #tpu.memory_space<vmem>>) attributes {dimension_semantics = [#tpu.dimension_semantics<parallel>], iteration_bounds = array<i64: 2>, scalar_prefetch = 0 : i64, scratch_operands = 0 : i64, tpu.core_type = #tpu.core_type<tc>, window_params = [{transform_indices = @transform_0, window_bounds = array<i64: 152, 44>}, {pipeline_mode = #tpu.pipeline_mode<synchronous>, transform_indices = @transform_1, window_bounds = array<i64: 44, 176>}, {pipeline_mode = #tpu.pipeline_mode<synchronous>, transform_indices = @transform_2, window_bounds = array<i64: 1, 176>}, {pipeline_mode = #tpu.pipeline_mode<synchronous>, transform_indices = @transform_3, window_bounds = array<i64: 176, 176>}, {pipeline_mode = #tpu.pipeline_mode<synchronous>, transform_indices = @transform_4, window_bounds = array<i64: 1, 176>}, {pipeline_mode = #tpu.pipeline_mode<synchronous>, transform_indices = @transform_5, window_bounds = array<i64: 176, 176>}, {pipeline_mode = #tpu.pipeline_mode<synchronous>, transform_indices = @transform_6, window_bounds = array<i64: 1, 176>}, {pipeline_mode = #tpu.pipeline_mode<synchronous>, transform_indices = @transform_7, window_bounds = array<i64: 176, 176>}, {pipeline_mode = #tpu.pipeline_mode<synchronous>, transform_indices = @transform_8, window_bounds = array<i64: 1, 176>}, {pipeline_mode = #tpu.pipeline_mode<synchronous>, transform_indices = @transform_9, window_bounds = array<i64: 176, 176>}, {pipeline_mode = #tpu.pipeline_mode<synchronous>, transform_indices = @transform_10, window_bounds = array<i64: 1, 176>}, {pipeline_mode = #tpu.pipeline_mode<synchronous>, transform_indices = @transform_11, window_bounds = array<i64: 1, 176>}, {pipeline_mode = #tpu.pipeline_mode<synchronous>, transform_indices = @transform_12, window_bounds = array<i64: 1, 1>}, {transform_indices = @transform_13, window_bounds = array<i64: 152, 1>}]} {
    %c0 = arith.constant 0 : index
    %c0_0 = arith.constant 0 : index
    %0 = vector.load %arg1[%c0, %c0_0] : memref<152x44xbf16, #tpu.memory_space<vmem>>, vector<152x44xbf16>
    %c0_1 = arith.constant 0 : index
    %c0_2 = arith.constant 0 : index
    %1 = vector.load %arg2[%c0_1, %c0_2] : memref<44x176xbf16, #tpu.memory_space<vmem>>, vector<44x176xbf16>
    %cst = arith.constant dense<0.000000e+00> : vector<152x176xf32>
    %2 = tpu.matmul %0, %1, %cst {dimension_numbers = #tpu.dot_dimension_numbers<[1], [0], [0], [1], [0, 0, 1, 1], [], []>} : vector<152x44xbf16>, vector<44x176xbf16>, vector<152x176xf32> -> vector<152x176xf32>
    %c0_3 = arith.constant 0 : index
    %c0_4 = arith.constant 0 : index
    %3 = vector.load %arg3[%c0_3, %c0_4] : memref<1x176xf32, #tpu.memory_space<vmem>>, vector<1x176xf32>
    %4 = vector.broadcast %3 : vector<1x176xf32> to vector<152x176xf32>
    %5 = arith.addf %2, %4 : vector<152x176xf32>
    %cst_5 = arith.constant 2.000000e-01 : f32
    %6 = vector.broadcast %cst_5 : f32 to vector<152x176xf32>
    %7 = arith.mulf %6, %5 : vector<152x176xf32>
    %8 = arith.maximumf %5, %7 : vector<152x176xf32>
    %9 = arith.truncf %8 : vector<152x176xf32> to vector<152x176xbf16>
    %c0_6 = arith.constant 0 : index
    %c0_7 = arith.constant 0 : index
    %10 = vector.load %arg4[%c0_6, %c0_7] : memref<176x176xbf16, #tpu.memory_space<vmem>>, vector<176x176xbf16>
    %cst_8 = arith.constant dense<0.000000e+00> : vector<152x176xf32>
    %11 = tpu.matmul %9, %10, %cst_8 {dimension_numbers = #tpu.dot_dimension_numbers<[1], [0], [0], [1], [0, 0, 1, 1], [], []>} : vector<152x176xbf16>, vector<176x176xbf16>, vector<152x176xf32> -> vector<152x176xf32>
    %c0_9 = arith.constant 0 : index
    %c0_10 = arith.constant 0 : index
    %12 = vector.load %arg5[%c0_9, %c0_10] : memref<1x176xf32, #tpu.memory_space<vmem>>, vector<1x176xf32>
    %13 = vector.broadcast %12 : vector<1x176xf32> to vector<152x176xf32>
    %14 = arith.addf %11, %13 : vector<152x176xf32>
    %cst_11 = arith.constant 2.000000e-01 : f32
    %15 = vector.broadcast %cst_11 : f32 to vector<152x176xf32>
    %16 = arith.mulf %15, %14 : vector<152x176xf32>
    %17 = arith.maximumf %14, %16 : vector<152x176xf32>
    %18 = arith.truncf %17 : vector<152x176xf32> to vector<152x176xbf16>
    %c0_12 = arith.constant 0 : index
    %c0_13 = arith.constant 0 : index
    %19 = vector.load %arg6[%c0_12, %c0_13] : memref<176x176xbf16, #tpu.memory_space<vmem>>, vector<176x176xbf16>
    %cst_14 = arith.constant dense<0.000000e+00> : vector<152x176xf32>
    %20 = tpu.matmul %18, %19, %cst_14 {dimension_numbers = #tpu.dot_dimension_numbers<[1], [0], [0], [1], [0, 0, 1, 1], [], []>} : vector<152x176xbf16>, vector<176x176xbf16>, vector<152x176xf32> -> vector<152x176xf32>
    %c0_15 = arith.constant 0 : index
    %c0_16 = arith.constant 0 : index
    %21 = vector.load %arg7[%c0_15, %c0_16] : memref<1x176xf32, #tpu.memory_space<vmem>>, vector<1x176xf32>
    %22 = vector.broadcast %21 : vector<1x176xf32> to vector<152x176xf32>
    %23 = arith.addf %20, %22 : vector<152x176xf32>
    %cst_17 = arith.constant 2.000000e-01 : f32
    %24 = vector.broadcast %cst_17 : f32 to vector<152x176xf32>
    %25 = arith.mulf %24, %23 : vector<152x176xf32>
    %26 = arith.maximumf %23, %25 : vector<152x176xf32>
    %27 = arith.truncf %26 : vector<152x176xf32> to vector<152x176xbf16>
    %c0_18 = arith.constant 0 : index
    %c0_19 = arith.constant 0 : index
    %28 = vector.load %arg8[%c0_18, %c0_19] : memref<176x176xbf16, #tpu.memory_space<vmem>>, vector<176x176xbf16>
    %cst_20 = arith.constant dense<0.000000e+00> : vector<152x176xf32>
    %29 = tpu.matmul %27, %28, %cst_20 {dimension_numbers = #tpu.dot_dimension_numbers<[1], [0], [0], [1], [0, 0, 1, 1], [], []>} : vector<152x176xbf16>, vector<176x176xbf16>, vector<152x176xf32> -> vector<152x176xf32>
    %c0_21 = arith.constant 0 : index
    %c0_22 = arith.constant 0 : index
    %30 = vector.load %arg9[%c0_21, %c0_22] : memref<1x176xf32, #tpu.memory_space<vmem>>, vector<1x176xf32>
    %31 = vector.broadcast %30 : vector<1x176xf32> to vector<152x176xf32>
    %32 = arith.addf %29, %31 : vector<152x176xf32>
    %cst_23 = arith.constant 2.000000e-01 : f32
    %33 = vector.broadcast %cst_23 : f32 to vector<152x176xf32>
    %34 = arith.mulf %33, %32 : vector<152x176xf32>
    %35 = arith.maximumf %32, %34 : vector<152x176xf32>
    %36 = arith.truncf %35 : vector<152x176xf32> to vector<152x176xbf16>
    %c0_24 = arith.constant 0 : index
    %c0_25 = arith.constant 0 : index
    %37 = vector.load %arg10[%c0_24, %c0_25] : memref<176x176xbf16, #tpu.memory_space<vmem>>, vector<176x176xbf16>
    %cst_26 = arith.constant dense<0.000000e+00> : vector<152x176xf32>
    %38 = tpu.matmul %36, %37, %cst_26 {dimension_numbers = #tpu.dot_dimension_numbers<[1], [0], [0], [1], [0, 0, 1, 1], [], []>} : vector<152x176xbf16>, vector<176x176xbf16>, vector<152x176xf32> -> vector<152x176xf32>
    %c0_27 = arith.constant 0 : index
    %c0_28 = arith.constant 0 : index
    %39 = vector.load %arg11[%c0_27, %c0_28] : memref<1x176xf32, #tpu.memory_space<vmem>>, vector<1x176xf32>
    %40 = vector.broadcast %39 : vector<1x176xf32> to vector<152x176xf32>
    %41 = arith.addf %38, %40 : vector<152x176xf32>
    %cst_29 = arith.constant 2.000000e-01 : f32
    %42 = vector.broadcast %cst_29 : f32 to vector<152x176xf32>
    %43 = arith.mulf %42, %41 : vector<152x176xf32>
    %44 = arith.maximumf %41, %43 : vector<152x176xf32>
    %c0_30 = arith.constant 0 : index
    %c0_31 = arith.constant 0 : index
    %45 = vector.load %arg12[%c0_30, %c0_31] : memref<1x176xf32, #tpu.memory_space<vmem>>, vector<1x176xf32>
    %46 = vector.broadcast %45 : vector<1x176xf32> to vector<152x176xf32>
    %47 = arith.mulf %44, %46 : vector<152x176xf32>
    %cst_32 = arith.constant dense<0.000000e+00> : vector<152xf32>
    %48 = vector.multi_reduction <add>, %47, %cst_32 [1] : vector<152x176xf32> to vector<152xf32>
    %49 = vector.shape_cast %48 : vector<152xf32> to vector<152x1xf32>
    %c0_33 = arith.constant 0 : index
    %c0_34 = arith.constant 0 : index
    %50 = vector.load %arg13[%c0_33, %c0_34] : memref<1x1xf32, #tpu.memory_space<vmem>>, vector<1x1xf32>
    %51 = vector.broadcast %50 : vector<1x1xf32> to vector<152x1xf32>
    %52 = arith.addf %49, %51 : vector<152x1xf32>
    %53 = arith.negf %52 : vector<152x1xf32>
    %54 = math.exp %53 : vector<152x1xf32>
    %cst_35 = arith.constant 1.000000e+00 : f32
    %55 = vector.broadcast %cst_35 : f32 to vector<152x1xf32>
    %56 = arith.addf %55, %54 : vector<152x1xf32>
    %57 = arith.divf %55, %56 : vector<152x1xf32>
    %c0_36 = arith.constant 0 : index
    %c0_37 = arith.constant 0 : index
    %58 = vector.load %arg14[%c0_36, %c0_37] : memref<152x1xf32, #tpu.memory_space<vmem>>, vector<152x1xf32>
    tpu.vector_store %arg14[%c0_36, %c0_37], %57 {strides = array<i32>} : memref<152x1xf32, #tpu.memory_space<vmem>>, vector<152x1xf32>,
    return
  }
  func.func @transform_0(%arg0: i32) -> (i32, i32) {
    %c0_i32 = arith.constant 0 : i32
    %c0_i32_0 = arith.constant 0 : i32
    return %arg0, %c0_i32 : i32, i32
  }
  func.func @transform_1(%arg0: i32) -> (i32, i32) {
    %c0_i32 = arith.constant 0 : i32
    %c0_i32_0 = arith.constant 0 : i32
    %c0_i32_1 = arith.constant 0 : i32
    return %c0_i32, %c0_i32_0 : i32, i32
  }
  func.func @transform_2(%arg0: i32) -> (i32, i32) {
    %c0_i32 = arith.constant 0 : i32
    %c0_i32_0 = arith.constant 0 : i32
    %c0_i32_1 = arith.constant 0 : i32
    return %c0_i32, %c0_i32_0 : i32, i32
  }
  func.func @transform_3(%arg0: i32) -> (i32, i32) {
    %c0_i32 = arith.constant 0 : i32
    %c0_i32_0 = arith.constant 0 : i32
    %c0_i32_1 = arith.constant 0 : i32
    return %c0_i32, %c0_i32_0 : i32, i32
  }
  func.func @transform_4(%arg0: i32) -> (i32, i32) {
    %c0_i32 = arith.constant 0 : i32
    %c0_i32_0 = arith.constant 0 : i32
    %c0_i32_1 = arith.constant 0 : i32
    return %c0_i32, %c0_i32_0 : i32, i32
  }
  func.func @transform_5(%arg0: i32) -> (i32, i32) {
    %c0_i32 = arith.constant 0 : i32
    %c0_i32_0 = arith.constant 0 : i32
    %c0_i32_1 = arith.constant 0 : i32
    return %c0_i32, %c0_i32_0 : i32, i32
  }
  func.func @transform_6(%arg0: i32) -> (i32, i32) {
    %c0_i32 = arith.constant 0 : i32
    %c0_i32_0 = arith.constant 0 : i32
    %c0_i32_1 = arith.constant 0 : i32
    return %c0_i32, %c0_i32_0 : i32, i32
  }
  func.func @transform_7(%arg0: i32) -> (i32, i32) {
    %c0_i32 = arith.constant 0 : i32
    %c0_i32_0 = arith.constant 0 : i32
    %c0_i32_1 = arith.constant 0 : i32
    return %c0_i32, %c0_i32_0 : i32, i32
  }
  func.func @transform_8(%arg0: i32) -> (i32, i32) {
    %c0_i32 = arith.constant 0 : i32
    %c0_i32_0 = arith.constant 0 : i32
    %c0_i32_1 = arith.constant 0 : i32
    return %c0_i32, %c0_i32_0 : i32, i32
  }
  func.func @transform_9(%arg0: i32) -> (i32, i32) {
    %c0_i32 = arith.constant 0 : i32
    %c0_i32_0 = arith.constant 0 : i32
    %c0_i32_1 = arith.constant 0 : i32
    return %c0_i32, %c0_i32_0 : i32, i32
  }
  func.func @transform_10(%arg0: i32) -> (i32, i32) {
    %c0_i32 = arith.constant 0 : i32
    %c0_i32_0 = arith.constant 0 : i32
    %c0_i32_1 = arith.constant 0 : i32
    return %c0_i32, %c0_i32_0 : i32, i32
  }
  func.func @transform_11(%arg0: i32) -> (i32, i32) {
    %c0_i32 = arith.constant 0 : i32
    %c0_i32_0 = arith.constant 0 : i32
    %c0_i32_1 = arith.constant 0 : i32
    return %c0_i32, %c0_i32_0 : i32, i32
  }
  func.func @transform_12(%arg0: i32) -> (i32, i32) {
    %c0_i32 = arith.constant 0 : i32
    %c0_i32_0 = arith.constant 0 : i32
    %c0_i32_1 = arith.constant 0 : i32
    return %c0_i32, %c0_i32_0 : i32, i32
  }
  func.func @transform_13(%arg0: i32) -> (i32, i32) {
    %c0_i32 = arith.constant 0 : i32
    %c0_i32_0 = arith.constant 0 : i32
    return %arg0, %c0_i32 : i32, i32
  }
}

</mosaic_0001>

<bundles_post_ra>
// kernel: tpu_custom_call.1
= control target key start
LH: loop header
LB: loop body
LE: loop exit
PB: predicated region body
PF: predicated region fallthrough
CT: control target
= control target key end

     0   :  { %s4153_s0 = inlined_call_operand.vmem [shape: bf16[304,44], index: 0, kind: input, shape index: {}]   ;;  %s4154_s1 = inlined_call_operand.vmem [shape: bf16[44,176], index: 1, kind: input, shape index: {}]   ;;  %s4155_s2 = inlined_call_operand.vmem [shape: f32[1,176], index: 2, kind: input, shape index: {}]   ;;  %s4156_s3 = inlined_call_operand.vmem [shape: bf16[176,176], index: 3, kind: input, shape index: {}]   ;;  %s4157_s4 = inlined_call_operand.vmem [shape: f32[1,176], index: 4, kind: input, shape index: {}]   ;;  %s4158_s5 = inlined_call_operand.hbm [shape: bf16[176,176], index: 5, kind: input, shape index: {}]   ;;  %s4159_s6 = inlined_call_operand.vmem [shape: f32[1,176], index: 6, kind: input, shape index: {}]   ;;  %s4160_s7 = inlined_call_operand.hbm [shape: bf16[176,176], index: 7, kind: input, shape index: {}]   ;;  %s4161_s8 = inlined_call_operand.vmem [shape: f32[1,176], index: 8, kind: input, shape index: {}]   ;;  %s4162_s9 = inlined_call_operand.hbm [shape: bf16[176,176], index: 9, kind: input, shape index: {}]   ;;  %s4163_s10 = inlined_call_operand.vmem [shape: f32[1,176], index: 10, kind: input, shape index: {}]   ;;  %s4164_s11 = inlined_call_operand.vmem [shape: f32[1,176], index: 11, kind: input, shape index: {}]   ;;  %s4165_s12 = inlined_call_operand.<no memory space> [shape: f32[1,1], index: 12, kind: input, shape index: {}]   ;;  %s4166_s13 = inlined_call_operand.vmem [shape: f32[304,1], index: 13, kind: output, shape index: {}]  }
   0x1   :  { %4171 = sst [smem:[#allocation10_spill]] %s4166_s13  ;;  %v18_v0 = vstv %s4165_s12 }
   0x2   :  { %19 = vst [vmem:[#allocation2] sm:$0x1] %v18_v0 }
   0x3   :  { %20 = vsyncpa [#allocation4], 0 }
   0x4   :  { %21 = vsyncpa [#allocation6], 0  ;;  %s3471_s27 = smov 0  }
   0x5 LB: > { %s4170_s28 = sadd.s32 4294967295, %s3390_s27   ;;  %p2829_p0 = scmp.ge.s32.totalorder %s3390_s27, 1  ;;  %s3390_s27 = sphi %s3471_s27, %s27_s27  }
   0x6   : > { %p336_p1 = scmp.lt.s32.totalorder %s3390_s27, 3  ;;  %p3481_p2 = scmp.eq.s32.totalorder %s4170_s28, 0 }
   0x7   : > { %s3392_s30 = smov [#allocation5]   ;;  %s3393_s15 = smov [#allocation3]  }
   0x8   : > { %s4172_s12 = scalar_select %p3481_p2, 1, 0 }
   0x9   : > { %p3485_p3 = pnand %p2829_p0, %p336_p1  ;;  %s376_s14 = sshll.u32 %s3392_s30, 4  ;;  %s377_s14 = int_to_ptr.vmem [resolvable:$true] %s376_s14 }
   0xa   : > { %s360_s16 = sshll.u32 %s3393_s15, 4  ;;  %s3394_s18 = smov [#allocation7]   ;;  %s3497_s16 = int_to_ptr.vmem [resolvable:$true] %s360_s16 }
   0xb   : > { %s4173_s29 = scalar_select %p3485_p3, 1, 0 }
   0xc   : > { %p3035_p4 = pneg %p3485_p3  ;;  %s392_s19 = sshll.u32 %s3394_s18, 4  ;;  %s3499_s19 = int_to_ptr.vmem [resolvable:$true] %s392_s19 }
   0xd   : > { %s3292_s22 = scalar_lea.hbm %s4160_s7, 2816 }
   0xe   : > { %p3493_p5 = pnand %p3481_p2, %p3035_p4  ;;  %p3293_p6 = scmp.ne.s32.totalorder %s4160_s7, %s3292_s22 }
   0xf   : > { %p3299_p10 = scmp.lt.u32.totalorder %s3292_s22, %s4160_s7 }
  0x10   : > { %p3509_p7 = pneg %p3493_p5 }
  0x12   : > { %p3295_p8 = pnand %p3509_p7, %p3293_p6 }
  0x14   : > { %p3296_p9 = pneg %p3295_p8 }
  0x16   : > { %p3301_p11 = pnand %p3299_p10, %p3296_p9 }
  0x18   : > { %3304 = shalt.err (!%p3301_p11)
}
  0x19   : > { %s3305_s15 = scalar_lea.vmem %s377_s14, 2816  ;;  %p3313_p1 = scmp.lt.s32.totalorder %s377_s14, %s377_s14 }
  0x1a   : > { %p3306_p12 = scmp.ne.s32.totalorder %s377_s14, %s3305_s15  ;;  %p3314_p4 = scmp.lt.s32.totalorder %s3305_s15, %s3305_s15 }
  0x1c   : > { %p3308_p13 = pnand %p3306_p12, %p3509_p7  ;;  %p3315_p2 = por %p3314_p4, %p3313_p1 }
  0x1e   : > { %p3309_p0 = pneg %p3308_p13 }
  0x20   : > { %p3316_p3 = pnand %p3315_p2, %p3309_p0 }
  0x22   : > { %3319 = shalt.err (!%p3316_p3)
}
  0x23   : > { %s3395_s18 = smov 128   ;;  %s3396_s20 = smov 8  }
  0x24   : > { %3041 = dma.hbm_to_vmem [thread:$0]  (!%p3493_p5), %s4160_s7, 2816, %s377_s14, [#allocation6], %s3395_s18, %s3395_s18, %s3396_s20  }
  0x25   : > { %s3320_s26 = scalar_lea.hbm %s4158_s5, 2816 }
  0x26   : > { %p3321_p2 = scmp.ne.s32.totalorder %s4158_s5, %s3320_s26  ;;  %p3327_p8 = scmp.lt.u32.totalorder %s3320_s26, %s4158_s5 }
  0x28   : > { %p3323_p3 = pnand %p3321_p2, %p3509_p7 }
  0x2a   : > { %p3324_p6 = pneg %p3323_p3 }
  0x2c   : > { %p3329_p9 = pnand %p3327_p8, %p3324_p6 }
  0x2e   : > { %3332 = shalt.err (!%p3329_p9)
}
  0x2f   : > { %s3333_s14 = scalar_lea.vmem %s3497_s16, 2816  ;;  %p3341_p13 = scmp.lt.s32.totalorder %s3497_s16, %s3497_s16 }
  0x30   : > { %p3334_p10 = scmp.ne.s32.totalorder %s3497_s16, %s3333_s14  ;;  %p3342_p0 = scmp.lt.s32.totalorder %s3333_s14, %s3333_s14 }
  0x32   : > { %p3336_p11 = pnand %p3334_p10, %p3509_p7  ;;  %p3343_p1 = por %p3342_p0, %p3341_p13 }
  0x34   : > { %p3337_p12 = pneg %p3336_p11 }
  0x36   : > { %p3344_p4 = pnand %p3343_p1, %p3337_p12 }
  0x38   : > { %3347 = shalt.err (!%p3344_p4)
}
  0x39   : > { %3038 = dma.hbm_to_vmem [thread:$0]  (!%p3493_p5), %s4158_s5, 2816, %s3497_s16, [#allocation4], %s3395_s18, %s3395_s18, %s3396_s20  }
  0x3a   : > { %s3348_s23 = scalar_lea.hbm %s4162_s9, 2816 }
  0x3b   : > { %p3349_p2 = scmp.ne.s32.totalorder %s4162_s9, %s3348_s23  ;;  %p3355_p8 = scmp.lt.u32.totalorder %s3348_s23, %s4162_s9 }
  0x3d   : > { %p3351_p3 = pnand %p3349_p2, %p3509_p7 }
  0x3f   : > { %p3352_p6 = pneg %p3351_p3 }
  0x41   : > { %p3357_p9 = pnand %p3355_p8, %p3352_p6 }
  0x43   : > { %3360 = shalt.err (!%p3357_p9)
}
  0x44   : > { %s3361_s16 = scalar_lea.vmem %s3499_s19, 2816  ;;  %p3369_p13 = scmp.lt.s32.totalorder %s3499_s19, %s3499_s19 }
  0x45   : > { %p3362_p10 = scmp.ne.s32.totalorder %s3499_s19, %s3361_s16  ;;  %p3370_p0 = scmp.lt.s32.totalorder %s3361_s16, %s3361_s16 }
  0x47   : > { %p3364_p11 = pnand %p3362_p10, %p3509_p7  ;;  %p3371_p1 = por %p3370_p0, %p3369_p13 }
  0x49   : > { %p3365_p12 = pneg %p3364_p11 }
  0x4b   : > { %p3372_p4 = pnand %p3371_p1, %p3365_p12 }
  0x4d   : > { %3375 = shalt.err (!%p3372_p4)
}
  0x4e   : > { %3044 = dma.hbm_to_vmem [thread:$0]  (!%p3493_p5), %s4162_s9, 2816, %s3499_s19, [#allocation6], %s3395_s18, %s3395_s18, %s3396_s20  }
  0x4f   : > { %p4176_p2 = scmp.ne.s32.totalorder %s4173_s29, 0 }
  0x50   : > { %p4177_p7 = scmp.ne.s32.totalorder (!%p4176_p2), %s4172_s12, 0 }
  0x51   : > { %426 = sbr.rel (%p4176_p2) target bundleno = 1468 (0x5bc), region = 72 }
  0x58   : > { %3381 = dma.done.wait (%p4177_p7), [#allocation4], 2816  }
  0x59   : > { %3383 = vsyncadd (%p4177_p7), [#allocation4], 4294964480 }
  0x5a   : > { %3385 = dma.done.wait (%p4177_p7), [#allocation6], 5632  }
  0x5b   : > { %3387 = vsyncadd (%p4177_p7), [#allocation6], 4294961664  ;;  %s4178_s17 = sadd.s32 4294967295, %s3390_s27   ;;  %v3397_v1 = vmov 0   ;;  %v3065_v2 = vld [vmem:[%s4154_s1 + $0x4] ss:$8 sps:$4 sm:$0xff]   ;;  %v518_v57 = vlaneseq }
  0x5c   : > { %s478_s25 = smul.u32 19, %s4178_s17  ;;  %674 = vmatprep.mubr.bf16.mxu0 %v3397_v1  ;;  %734 = vmatprep.mubr.bf16.mxu1 %v3397_v1  ;;  %v3067_v3 = vld [vmem:[%s4154_s1] ss:$8 sps:$4 sm:$0xff]   ;;  %v3068_v4 = vld [vmem:[%s4154_s1 + $0x14] ss:$8 sps:$4 sm:$0xff]   ;;  %vm635_vm0 = vcmask 1045504  }
  0x5d   : > { %642 = vmatprep.subr.bf16.mxu0 %v3065_v2  ;;  %v3070_v5 = vld [vmem:[%s4154_s1 + $0x10] ss:$8 sps:$4 sm:$0xff]   ;;  %3017 = vmatprep.subr.bf16.mxu1 %v3065_v2  ;;  %v3071_v6 = vld [vmem:[%s4154_s1 + $0x24] ss:$8 sps:$4 sm:$0x3f]   ;;  %vm604_vm1 = vcmask 359424  }
  0x5e   : > { %p479_p5 = scmp.lt.s32.totalorder %s478_s25, 37  ;;  %643 = vmatpush1.bf16.msra.mxu0 %v3067_v3  ;;  %3020 = vmatpush1.bf16.msra.mxu1 %v3067_v3  ;;  %v3073_v7 = vld [vmem:[%s4154_s1 + $0x20] ss:$8 sps:$4 sm:$0x3f]   ;;  %v3086_v12 = vld [vmem:[%s4156_s3 + $0x4] ss:$8 sps:$4 sm:$0xff]  }
  0x5f   : > { %644 = vmatprep.subr.bf16.mxu0 %v3068_v4  ;;  %3018 = vmatprep.subr.bf16.mxu1 %v3068_v4  ;;  %v637_v8 = vsel %vm635_vm0, %v3073_v7, 0  ;;  %v3084_v11 = vld [vmem:[%s4156_s3] ss:$8 sps:$4 sm:$0xff]   ;;  %v3089_v13 = vld [vmem:[%s4156_s3 + $0x14] ss:$8 sps:$4 sm:$0xff]   ;;  %v519_v60 = vshrl.u32 %v518_v57, 7 }
  0x60   : > { %s4181_s25 = smov (!%p479_p5, %s478_s25), 37  ;;  %v3087_v14 = vld [vmem:[%s4156_s3 + $0x10] ss:$8 sps:$4 sm:$0xff]   ;;  %v3092_v17 = vld [vmem:[%s4156_s3 + $0x24] ss:$8 sps:$4 sm:$0xff]   ;;  %vm1013_vm2 = vcmask 392192  }
  0x61   : > { %s2838_s18 = sshll.u32 %s4181_s25, 2  ;;  %v3090_v18 = vld [vmem:[%s4156_s3 + $0x20] ss:$8 sps:$4 sm:$0xff]   ;;  %v3095_v19 = vld [vmem:[%s4156_s3 + $0x34] ss:$8 sps:$4 sm:$0xff]   ;;  %v3714_v61 = vsub.s32 0, %v519_v60 }
  0x62   : > { %s3615_s16 = scalar_lea.vmem %s4153_s0, %s2838_s18  ;;  %645 = vmatpush1.bf16.msra.mxu0 %v3070_v5  ;;  %3021 = vmatpush1.bf16.msra.mxu1 %v3070_v5  ;;  %v3093_v22 = vld [vmem:[%s4156_s3 + $0x30] ss:$8 sps:$4 sm:$0xff]   ;;  %v3098_v23 = vld [vmem:[%s4156_s3 + $0x44] ss:$8 sps:$4 sm:$0xff]   ;;  %v3096_v24 = vld [vmem:[%s4156_s3 + $0x40] ss:$8 sps:$4 sm:$0xff]  }
  0x63   : > { %2856 = vmatprep.subr.msk.bf16.mxu0 %vm635_vm0, %v3071_v6  ;;  %3019 = vmatprep.subr.msk.bf16.mxu1 %vm635_vm0, %v3071_v6  ;;  %v3074_v9 = vld [vmem:[%s3615_s16] sm:$0xff]   ;;  %v3080_v10 = vld [vmem:[%s3615_s16 + $0x30] sm:$0xff]   ;;  %v3075_v15 = vld [vmem:[%s3615_s16 + $0x8] sm:$0xff]   ;;  %v3719_v63 = vsub.s32 1, %v519_v60  ;;  %s2839_s21 = sshll.u32 %s4181_s25, 3  ;;  %s4179_s23 = sld [smem:[#allocation10_spill]] }
  0x64   : > { %v3081_v16 = vld [vmem:[%s3615_s16 + $0x38] sm:$0xff]   ;;  %v3076_v20 = vld [vmem:[%s3615_s16 + $0x10] sm:$0xff]   ;;  %v3082_v21 = vld [vmem:[%s3615_s16 + $0x40] sm:$0xff]   ;;  %vm2720_vm3 = vcmask 7168  }
  0x65   : > { %v3101_v25 = vld [vmem:[%s4156_s3 + $0x54] ss:$8 sps:$4 sm:$0xff]   ;;  %v3099_v26 = vld [vmem:[%s4156_s3 + $0x50] ss:$8 sps:$4 sm:$0xff]   ;;  %v3083_v28 = vld [vmem:[%s3615_s16 + $0x48] ss:$0 sps:$4 sm:$0xff]  }
  0x66   : > { %647 = vmatpush1.bf16.msra.mxu0 %v637_v8  ;;  %3022 = vmatpush1.bf16.msra.mxu1 %v637_v8  ;;  %v3077_v27 = vld [vmem:[%s3615_s16 + $0x18] sm:$0xff]   ;;  %v3104_v29 = vld [vmem:[%s4156_s3 + $0x64] ss:$8 sps:$4 sm:$0xff]   ;;  %v3102_v30 = vld [vmem:[%s4156_s3 + $0x60] ss:$8 sps:$4 sm:$0xff]  }
  0x67   : > { %1044 = vmatprep.subr.bf16.mxu1 %v3086_v12  ;;  %v3107_v31 = vld [vmem:[%s4156_s3 + $0x74] ss:$8 sps:$4 sm:$0xff]   ;;  %v3105_v32 = vld [vmem:[%s4156_s3 + $0x70] ss:$8 sps:$4 sm:$0xff]   ;;  %v3078_v33 = vld [vmem:[%s3615_s16 + $0x20] sm:$0xff]  }
  0x68   : > { %v3079_v34 = vld [vmem:[%s3615_s16 + $0x28] sm:$0xff]   ;;  %v3113_v37 = vld [vmem:[%s4156_s3 + $0x94] ss:$8 sps:$4 sm:$0xff]   ;;  %v3111_v38 = vld [vmem:[%s4156_s3 + $0x90] ss:$8 sps:$4 sm:$0xff]  }
  0x69   : > { %2857 = vmatmul.mubr.msk.bf16.vlgmr.msra.gmra.mrb[0].mxu0 %vm604_vm1, %v3074_v9  ;;  %2863 = vmatmul.mubr.msk.bf16.vlgmr.msra.gmra.mrb[0].mxu1 %vm604_vm1, %v3080_v10  ;;  %v3110_v35 = vld [vmem:[%s4156_s3 + $0x84] ss:$8 sps:$4 sm:$0xff]   ;;  %v3108_v36 = vld [vmem:[%s4156_s3 + $0x80] ss:$8 sps:$4 sm:$0xff]   ;;  %v3120_v44 = vld [vmem:[#allocation3 + $0x10] ss:$8 sps:$4 sm:$0xff]   ;;  %s4098_s24 = scalar_lea.vmem %s4179_s23, %s2839_s21 }
  0x6a   : > { %684 = vmatprep.mubr.bf16.mxu0 %v3397_v1  ;;  %744 = vmatprep.mubr.bf16.mxu1 %v3397_v1  ;;  %v3116_v39 = vld [vmem:[%s4156_s3 + $0xa4] ss:$8 sps:$4 sm:$0xff]   ;;  %v3114_v40 = vld [vmem:[%s4156_s3 + $0xa0] ss:$8 sps:$4 sm:$0xff]   ;;  %v3126_v48 = vld [vmem:[#allocation3 + $0x30] ss:$8 sps:$4 sm:$0xff]  }
  0x6b   : > { %1045 = vmatpush1.bf16.msra.mxu1 %v3084_v11  ;;  %v3117_v41 = vld [vmem:[#allocation3] ss:$8 sps:$4 sm:$0xff]   ;;  %v3119_v42 = vld [vmem:[#allocation3 + $0x4] ss:$8 sps:$4 sm:$0xff]   ;;  %v3122_v43 = vld [vmem:[#allocation3 + $0x14] ss:$8 sps:$4 sm:$0xff]  }
  0x6c   : > { %1046 = vmatprep.subr.bf16.mxu1 %v3089_v13  ;;  %1445 = vmatprep.subr.bf16.mxu0 %v3119_v42  ;;  %v3125_v45 = vld [vmem:[#allocation3 + $0x24] ss:$8 sps:$4 sm:$0xff]   ;;  %v3123_v46 = vld [vmem:[#allocation3 + $0x20] ss:$8 sps:$4 sm:$0xff]   ;;  %v3128_v47 = vld [vmem:[#allocation3 + $0x34] ss:$8 sps:$4 sm:$0xff]  }
  0x6d   : > { %1446 = vmatpush1.bf16.msra.mxu0 %v3117_v41  ;;  %v3131_v49 = vld [vmem:[#allocation3 + $0x44] ss:$8 sps:$4 sm:$0xff]   ;;  %v3129_v50 = vld [vmem:[#allocation3 + $0x40] ss:$8 sps:$4 sm:$0xff]   ;;  %v3134_v51 = vld [vmem:[#allocation3 + $0x54] ss:$8 sps:$4 sm:$0xff]  }
  0x6e   : > { %1447 = vmatprep.subr.bf16.mxu0 %v3122_v43  ;;  %v3132_v52 = vld [vmem:[#allocation3 + $0x50] ss:$8 sps:$4 sm:$0xff]   ;;  %v3137_v53 = vld [vmem:[#allocation3 + $0x64] ss:$8 sps:$4 sm:$0xff]   ;;  %v3135_v54 = vld [vmem:[#allocation3 + $0x60] ss:$8 sps:$4 sm:$0xff]  }
  0x6f   : > { %1047 = vmatpush1.bf16.msra.mxu1 %v3087_v14  ;;  %v3140_v55 = vld [vmem:[#allocation3 + $0x74] ss:$8 sps:$4 sm:$0xff]   ;;  %v3138_v56 = vld [vmem:[#allocation3 + $0x70] ss:$8 sps:$4 sm:$0xff]   ;;  %v3143_v58 = vld [vmem:[#allocation3 + $0x84] ss:$8 sps:$4 sm:$0xff]  }
  0x70   : > { %1048 = vmatprep.subr.bf16.mxu1 %v3092_v17  ;;  %v3141_v59 = vld [vmem:[#allocation3 + $0x80] ss:$8 sps:$4 sm:$0xff]  }
  0x71   : > { %2858 = vmatmul.mubr.msk.bf16.gmra.mrb[4].mxu0 %vm604_vm1, %v3075_v15  ;;  %2864 = vmatmul.mubr.msk.bf16.gmra.mrb[4].mxu1 %vm604_vm1, %v3081_v16  ;;  %v516_v62 = vld [vmem:[%s4155_s2] sm:$0x3] }
  0x72   : > { %694 = vmatprep.mubr.bf16.mxu0 %v3397_v1  ;;  %754 = vmatprep.mubr.bf16.mxu1 %v3397_v1  ;;  %v3722_v0 = vrot.slane %v516_v62, %v3714_v61 }
  0x73   : > { %1049 = vmatpush1.bf16.msra.mxu1 %v3090_v18  ;;  %1448 = vmatpush1.bf16.msra.mxu0 %v3120_v44 }
  0x74   : > { %1050 = vmatprep.subr.bf16.mxu1 %v3095_v19  ;;  %1449 = vmatprep.subr.bf16.mxu0 %v3125_v45 }
  0x77   : > { %1051 = vmatpush1.bf16.msra.mxu1 %v3093_v22  ;;  %1450 = vmatpush1.bf16.msra.mxu0 %v3123_v46 }
  0x78   : > { %1052 = vmatprep.subr.bf16.mxu1 %v3098_v23  ;;  %1451 = vmatprep.subr.bf16.mxu0 %v3128_v47 }
  0x79   : > { %2859 = vmatmul.mubr.msk.bf16.gmra.mrb[8].mxu0 %vm604_vm1, %v3076_v20  ;;  %2865 = vmatmul.mubr.msk.bf16.gmra.mrb[8].mxu1 %vm604_vm1, %v3082_v21 }
  0x7a   : > { %704 = vmatprep.mubr.bf16.mxu0 %v3397_v1  ;;  %764 = vmatprep.mubr.bf16.mxu1 %v3397_v1 }
  0x7b   : > { %1053 = vmatpush1.bf16.msra.mxu1 %v3096_v24  ;;  %1452 = vmatpush1.bf16.msra.mxu0 %v3126_v48 }
  0x7c   : > { %1054 = vmatprep.subr.bf16.mxu1 %v3101_v25  ;;  %1453 = vmatprep.subr.bf16.mxu0 %v3131_v49 }
  0x7f   : > { %1055 = vmatpush1.bf16.msra.mxu1 %v3099_v26  ;;  %1454 = vmatpush1.bf16.msra.mxu0 %v3129_v50 }
  0x80   : > { %1056 = vmatprep.subr.bf16.mxu1 %v3104_v29  ;;  %1455 = vmatprep.subr.bf16.mxu0 %v3134_v51 }
  0x81   : > { %2860 = vmatmul.mubr.msk.bf16.gmra.mrb[12].mxu0 %vm604_vm1, %v3077_v27  ;;  %2866 = vmatmul.mubr.msk.bf16.gmra.mrb[12].mxu1 %vm604_vm1, %v3083_v28 }
  0x82   : > { %714 = vmatprep.mubr.bf16.mxu0 %v3397_v1 }
  0x83   : > { %1057 = vmatpush1.bf16.msra.mxu1 %v3102_v30  ;;  %1456 = vmatpush1.bf16.msra.mxu0 %v3132_v52 }
  0x84   : > { %1058 = vmatprep.subr.bf16.mxu1 %v3107_v31  ;;  %1457 = vmatprep.subr.bf16.mxu0 %v3137_v53 }
  0x87   : > { %1059 = vmatpush1.bf16.msra.mxu1 %v3105_v32  ;;  %1458 = vmatpush1.bf16.msra.mxu0 %v3135_v54 }
  0x88   : > { %1060 = vmatprep.subr.bf16.mxu1 %v3110_v35  ;;  %1459 = vmatprep.subr.bf16.mxu0 %v3140_v55 }
  0x89   : > { %2861 = vmatmul.mubr.msk.bf16.gmra.mrb[16].mxu0 %vm604_vm1, %v3078_v33 }
  0x8a   : > { %724 = vmatprep.mubr.bf16.mxu0 %v3397_v1  ;;  %v3725_v1 = vrot.slane %v516_v62, %v3719_v63 }
  0x8b   : > { %1061 = vmatpush1.bf16.msra.mxu1 %v3108_v36  ;;  %1460 = vmatpush1.bf16.msra.mxu0 %v3138_v56 }
  0x8c   : > { %1062 = vmatprep.subr.bf16.mxu1 %v3113_v37  ;;  %1461 = vmatprep.subr.bf16.mxu0 %v3143_v58 }
  0x8f   : > { %1063 = vmatpush1.bf16.msra.mxu1 %v3111_v38  ;;  %1462 = vmatpush1.bf16.msra.mxu0 %v3141_v59 }
  0x90   : > { %1064 = vmatprep.subr.bf16.mxu1 %v3116_v39 }
  0x91   : > { %2862 = vmatmul.mubr.msk.bf16.gmra.mrb[20].mxu0 %vm604_vm1, %v3079_v34 }
  0x93   : > { %1065 = vmatpush1.bf16.msra.mxu1 %v3114_v40 }
 0x13c   : > { %v676_v2 = vpop.f32.mrb[0].mxu0  ;;  %v736_v3 = vpop.f32.mrb[0].mxu1 }
 0x13d   : > { %v677_v4 = vadd.f32 %v676_v2, %v3722_v0  ;;  %v678_v5 = vpop.f32.mrb[1].mxu0  ;;  %v737_v6 = vadd.f32 %v736_v3, %v3722_v0  ;;  %v738_v7 = vpop.f32.mrb[1].mxu1 }
 0x13e   : > { %v679_v8 = vadd.f32 %v678_v5, %v3725_v1  ;;  %v680_v9 = vpop.f32.mrb[2].mxu0  ;;  %v739_v10 = vadd.f32 %v738_v7, %v3725_v1  ;;  %v740_v11 = vpop.f32.mrb[2].mxu1 }
 0x13f   : > { %v773_v12 = vmul.f32 0.2, %v677_v4  ;;  %v681_v13 = vadd.f32 %v680_v9, %v3722_v0  ;;  %v682_v14 = vpop.f32.mrb[3].mxu0  ;;  %v797_v15 = vmul.f32 0.2, %v737_v6  ;;  %v741_v16 = vadd.f32 %v740_v11, %v3722_v0  ;;  %v742_v17 = vpop.f32.mrb[3].mxu1 }
 0x140   : > { %v774_v18 = vmul.f32 0.2, %v679_v8  ;;  %v683_v19 = vadd.f32 %v682_v14, %v3725_v1  ;;  %v798_v20 = vmul.f32 0.2, %v739_v10  ;;  %v743_v21 = vadd.f32 %v742_v17, %v3725_v1 }
 0x141   : > { %v775_v22 = vmul.f32 0.2, %v681_v13  ;;  %v835_v23 = vmax.f32 %v737_v6, %v797_v15  ;;  %v799_v24 = vmul.f32 0.2, %v741_v16  ;;  %v811_v28 = vmax.f32 %v677_v4, %v773_v12 }
 0x142   : > { %v776_v25 = vmul.f32 0.2, %v683_v19  ;;  %v836_v26 = vmax.f32 %v739_v10, %v798_v20  ;;  %v800_v27 = vmul.f32 0.2, %v743_v21  ;;  %v812_v31 = vmax.f32 %v679_v8, %v774_v18 }
 0x143   : > { %v813_v29 = vmax.f32 %v681_v13, %v775_v22  ;;  %v837_v30 = vmax.f32 %v741_v16, %v799_v24 }
 0x144   : > { %v814_v32 = vmax.f32 %v683_v19, %v776_v25  ;;  %v686_v33 = vpop.f32.mrb[4].mxu0  ;;  %v838_v34 = vmax.f32 %v743_v21, %v800_v27  ;;  %v746_v35 = vpop.f32.mrb[4].mxu1 }
 0x145   : > { %v849_v36 = vpack.c.bf16 %v813_v29, %v811_v28  ;;  %v687_v37 = vadd.f32 %v686_v33, %v3722_v0  ;;  %v688_v38 = vpop.f32.mrb[5].mxu0  ;;  %v747_v39 = vadd.f32 %v746_v35, %v3722_v0  ;;  %v748_v40 = vpop.f32.mrb[5].mxu1  ;;  %v3737_v41 = vpack.c.bf16 %v837_v30, %v835_v23 }
 0x146   : > { %v850_v42 = vpack.c.bf16 %v814_v32, %v812_v31  ;;  %v689_v43 = vadd.f32 %v688_v38, %v3725_v1  ;;  %v690_v44 = vpop.f32.mrb[6].mxu0  ;;  %v3740_v45 = vpack.c.bf16 %v838_v34, %v836_v26  ;;  %v749_v46 = vadd.f32 %v748_v40, %v3725_v1  ;;  %v750_v47 = vpop.f32.mrb[6].mxu1 }
 0x147   : > { %v777_v48 = vmul.f32 0.2, %v687_v37  ;;  %v691_v49 = vadd.f32 %v690_v44, %v3722_v0  ;;  %v692_v50 = vpop.f32.mrb[7].mxu0  ;;  %v801_v51 = vmul.f32 0.2, %v747_v39  ;;  %v751_v52 = vadd.f32 %v750_v47, %v3722_v0  ;;  %v752_v53 = vpop.f32.mrb[7].mxu1 }
 0x148   : > { %v778_v54 = vmul.f32 0.2, %v689_v43  ;;  %v693_v55 = vadd.f32 %v692_v50, %v3725_v1  ;;  %2889 = vmatprep.mubr.msk.bf16.mxu1 %vm1013_vm2, %v850_v42  ;;  %v802_v56 = vmul.f32 0.2, %v749_v46  ;;  %v753_v57 = vadd.f32 %v752_v53, %v3725_v1 }
 0x149   : > { %v779_v58 = vmul.f32 0.2, %v691_v49  ;;  %1077 = vmatmul.mubr.bf16.vlgmr.msra.gmra.mrb[16].mxu1 %v849_v36  ;;  %v839_v59 = vmax.f32 %v747_v39, %v801_v51  ;;  %v803_v60 = vmul.f32 0.2, %v751_v52  ;;  %v815_v4 = vmax.f32 %v687_v37, %v777_v48 }
 0x14a   : > { %v780_v62 = vmul.f32 0.2, %v693_v55  ;;  %v840_v2 = vmax.f32 %v749_v46, %v802_v56  ;;  %v804_v3 = vmul.f32 0.2, %v753_v57  ;;  %v816_v7 = vmax.f32 %v689_v43, %v778_v54 }
 0x14b   : > { %v817_v5 = vmax.f32 %v691_v49, %v779_v58  ;;  %v841_v6 = vmax.f32 %v751_v52, %v803_v60 }
 0x14c   : > { %v818_v8 = vmax.f32 %v693_v55, %v780_v62  ;;  %v696_v9 = vpop.f32.mrb[8].mxu0  ;;  %v842_v10 = vmax.f32 %v753_v57, %v804_v3  ;;  %v756_v11 = vpop.f32.mrb[8].mxu1 }
 0x14d   : > { %v697_v12 = vadd.f32 %v696_v9, %v3722_v0  ;;  %v698_v13 = vpop.f32.mrb[9].mxu0  ;;  %v851_v14 = vpack.c.bf16 %v817_v5, %v815_v4  ;;  %v757_v15 = vadd.f32 %v756_v11, %v3722_v0  ;;  %v758_v16 = vpop.f32.mrb[9].mxu1  ;;  %v3750_v17 = vpack.c.bf16 %v841_v6, %v839_v59 }
 0x14e   : > { %v852_v18 = vpack.c.bf16 %v818_v8, %v816_v7  ;;  %v699_v19 = vadd.f32 %v698_v13, %v3725_v1  ;;  %v700_v20 = vpop.f32.mrb[10].mxu0  ;;  %v3753_v21 = vpack.c.bf16 %v842_v10, %v840_v2  ;;  %v759_v22 = vadd.f32 %v758_v16, %v3725_v1  ;;  %v760_v23 = vpop.f32.mrb[10].mxu1 }
 0x14f   : > { %v781_v24 = vmul.f32 0.2, %v697_v12  ;;  %v701_v25 = vadd.f32 %v700_v20, %v3722_v0  ;;  %v702_v26 = vpop.f32.mrb[11].mxu0  ;;  %v805_v27 = vmul.f32 0.2, %v757_v15  ;;  %v761_v28 = vadd.f32 %v760_v23, %v3722_v0  ;;  %v762_v29 = vpop.f32.mrb[11].mxu1 }
 0x150   : > { %v782_v30 = vmul.f32 0.2, %v699_v19  ;;  %v703_v31 = vadd.f32 %v702_v26, %v3725_v1  ;;  %2890 = vmatprep.mubr.msk.bf16.mxu1 %vm1013_vm2, %v852_v18  ;;  %v806_v32 = vmul.f32 0.2, %v759_v22  ;;  %v763_v33 = vadd.f32 %v762_v29, %v3725_v1 }
 0x151   : > { %v783_v34 = vmul.f32 0.2, %v701_v25  ;;  %1087 = vmatmul.mubr.bf16.gmra.mrb[20].mxu1 %v851_v14  ;;  %v843_v35 = vmax.f32 %v757_v15, %v805_v27  ;;  %v807_v36 = vmul.f32 0.2, %v761_v28  ;;  %v819_v40 = vmax.f32 %v697_v12, %v781_v24 }
 0x152   : > { %v784_v37 = vmul.f32 0.2, %v703_v31  ;;  %v844_v38 = vmax.f32 %v759_v22, %v806_v32  ;;  %v808_v39 = vmul.f32 0.2, %v763_v33  ;;  %v820_v44 = vmax.f32 %v699_v19, %v782_v30 }
 0x153   : > { %v821_v42 = vmax.f32 %v701_v25, %v783_v34  ;;  %v845_v43 = vmax.f32 %v761_v28, %v807_v36 }
 0x154   : > { %v822_v46 = vmax.f32 %v703_v31, %v784_v37  ;;  %v706_v47 = vpop.f32.mrb[12].mxu0  ;;  %v846_v48 = vmax.f32 %v763_v33, %v808_v39  ;;  %v766_v49 = vpop.f32.mrb[12].mxu1 }
 0x155   : > { %v707_v50 = vadd.f32 %v706_v47, %v3722_v0  ;;  %v708_v51 = vpop.f32.mrb[13].mxu0  ;;  %v853_v52 = vpack.c.bf16 %v821_v42, %v819_v40  ;;  %v3763_v53 = vadd.f32 %v766_v49, %v3722_v0  ;;  %v768_v54 = vpop.f32.mrb[13].mxu1  ;;  %v3765_v55 = vpack.c.bf16 %v845_v43, %v843_v35 }
 0x156   : > { %v854_v56 = vpack.c.bf16 %v822_v46, %v820_v44  ;;  %v709_v57 = vadd.f32 %v708_v51, %v3725_v1  ;;  %v710_v58 = vpop.f32.mrb[14].mxu0  ;;  %v3768_v59 = vpack.c.bf16 %v846_v48, %v844_v38  ;;  %v3771_v60 = vadd.f32 %v768_v54, %v3725_v1  ;;  %v770_v62 = vpop.f32.mrb[14].mxu1 }
 0x157   : > { %v785_v2 = vmul.f32 0.2, %v707_v50  ;;  %v711_v3 = vadd.f32 %v710_v58, %v3722_v0  ;;  %v712_v4 = vpop.f32.mrb[15].mxu0  ;;  %v771_v5 = vpop.f32.mrb[15].mxu1  ;;  %v809_v58 = vmul.f32 0.2, %v3763_v53 }
 0x158   : > { %v786_v6 = vmul.f32 0.2, %v709_v57  ;;  %v713_v7 = vadd.f32 %v712_v4, %v3725_v1  ;;  %2891 = vmatprep.mubr.msk.bf16.mxu1 %vm1013_vm2, %v854_v56  ;;  %v3155_v4 = vld [vmem:[#allocation5 + $0x14] ss:$8 sps:$4 sm:$0xff]   ;;  %v3156_v5 = vld [vmem:[#allocation5 + $0x20] ss:$8 sps:$4 sm:$0xff]  }
 0x159   : > { %v787_v8 = vmul.f32 0.2, %v711_v3  ;;  %1097 = vmatmul.mubr.bf16.gmra.mrb[24].mxu1 %v853_v52  ;;  %v823_v10 = vmax.f32 %v707_v50, %v785_v2  ;;  %v847_v2 = vmax.f32 %v3763_v53, %v809_v58  ;;  %v3153_v53 = vld [vmem:[#allocation5 + $0x10] ss:$8 sps:$4 sm:$0xff]  }
 0x15a   : > { %v788_v9 = vmul.f32 0.2, %v713_v7  ;;  %v824_v12 = vmax.f32 %v709_v57, %v786_v6  ;;  %v3161_v6 = vld [vmem:[#allocation5 + $0x34] ss:$8 sps:$4 sm:$0xff]  }
 0x15b   : > { %v825_v11 = vmax.f32 %v711_v3, %v787_v8  ;;  %v3147_v3 = vld [vmem:[#allocation3 + $0xa0] ss:$8 sps:$4 sm:$0xff]   ;;  %v3164_v8 = vld [vmem:[#allocation5 + $0x44] ss:$8 sps:$4 sm:$0xff]  }
 0x15c   : > { %v826_v13 = vmax.f32 %v713_v7, %v788_v9  ;;  %v716_v14 = vpop.f32.mrb[16].mxu0  ;;  %v3159_v7 = vld [vmem:[#allocation5 + $0x30] ss:$8 sps:$4 sm:$0xff]   ;;  %v3162_v9 = vld [vmem:[#allocation5 + $0x40] ss:$8 sps:$4 sm:$0xff]  }
 0x15d   : > { %v717_v15 = vadd.f32 %v716_v14, %v3722_v0  ;;  %v718_v16 = vpop.f32.mrb[17].mxu0  ;;  %v855_v18 = vpack.c.bf16 %v825_v11, %v823_v10  ;;  %v3167_v10 = vld [vmem:[#allocation5 + $0x54] ss:$8 sps:$4 sm:$0xff]   ;;  %v3165_v11 = vld [vmem:[#allocation5 + $0x50] ss:$8 sps:$4 sm:$0xff]  }
 0x15e   : > { %v856_v19 = vpack.c.bf16 %v826_v13, %v824_v12  ;;  %v719_v20 = vadd.f32 %v718_v16, %v3725_v1  ;;  %v720_v22 = vpop.f32.mrb[18].mxu0  ;;  %v3170_v12 = vld [vmem:[#allocation5 + $0x64] ss:$8 sps:$4 sm:$0xff]   ;;  %v3168_v13 = vld [vmem:[#allocation5 + $0x60] ss:$8 sps:$4 sm:$0xff]  }
 0x15f   : > { %v789_v23 = vmul.f32 0.2, %v717_v15  ;;  %v721_v24 = vadd.f32 %v720_v22, %v3722_v0  ;;  %v722_v25 = vpop.f32.mrb[19].mxu0  ;;  %v3173_v14 = vld [vmem:[#allocation5 + $0x74] ss:$8 sps:$4 sm:$0xff]  }
 0x160   : > { %v790_v26 = vmul.f32 0.2, %v719_v20  ;;  %v723_v27 = vadd.f32 %v722_v25, %v3725_v1  ;;  %2892 = vmatprep.mubr.msk.bf16.mxu1 %vm1013_vm2, %v856_v19  ;;  %v3176_v16 = vld [vmem:[#allocation5 + $0x84] ss:$8 sps:$4 sm:$0xff]   ;;  %v3179_v19 = vld [vmem:[#allocation5 + $0x94] ss:$8 sps:$4 sm:$0xff]  }
 0x161   : > { %v791_v28 = vmul.f32 0.2, %v721_v24  ;;  %1107 = vmatmul.mubr.bf16.gmra.mrb[28].mxu1 %v855_v18  ;;  %v827_v30 = vmax.f32 %v717_v15, %v789_v23  ;;  %v3171_v15 = vld [vmem:[#allocation5 + $0x70] ss:$8 sps:$4 sm:$0xff]   ;;  %v3174_v18 = vld [vmem:[#allocation5 + $0x80] ss:$8 sps:$4 sm:$0xff]  }
 0x162   : > { %v792_v29 = vmul.f32 0.2, %v723_v27  ;;  %v828_v32 = vmax.f32 %v719_v20, %v790_v26  ;;  %v3177_v20 = vld [vmem:[#allocation5 + $0x90] ss:$8 sps:$4 sm:$0xff]  }
 0x163   : > { %v829_v31 = vmax.f32 %v721_v24, %v791_v28  ;;  %v891_v22 = vld [vmem:[%s4157_s4] sm:$0x3] }
 0x164   : > { %v830_v33 = vmax.f32 %v723_v27, %v792_v29  ;;  %v726_v34 = vpop.f32.mrb[20].mxu0  ;;  %v3805_v23 = vrot.slane %v891_v22, %v3714_v61  ;;  %v3808_v24 = vrot.slane %v891_v22, %v3719_v63 }
 0x165   : > { %v727_v35 = vadd.f32 %v726_v34, %v3722_v0  ;;  %v728_v36 = vpop.f32.mrb[21].mxu0  ;;  %v857_v37 = vpack.c.bf16 %v829_v31, %v827_v30 }
 0x166   : > { %v858_v38 = vpack.c.bf16 %v830_v33, %v828_v32  ;;  %v729_v39 = vadd.f32 %v728_v36, %v3725_v1  ;;  %v730_v40 = vpop.f32.mrb[22].mxu0 }
 0x167   : > { %v793_v42 = vmul.f32 0.2, %v727_v35  ;;  %v731_v43 = vadd.f32 %v730_v40, %v3722_v0  ;;  %v732_v44 = vpop.f32.mrb[23].mxu0  ;;  %v810_v0 = vmul.f32 0.2, %v3771_v60 }
 0x168   : > { %v794_v46 = vmul.f32 0.2, %v729_v39  ;;  %v733_v47 = vadd.f32 %v732_v44, %v3725_v1  ;;  %2893 = vmatprep.mubr.msk.bf16.mxu1 %vm1013_vm2, %v858_v38 }
 0x169   : > { %v795_v48 = vmul.f32 0.2, %v731_v43  ;;  %1117 = vmatmul.mubr.bf16.gmra.mrb[32].mxu1 %v857_v37  ;;  %v831_v50 = vmax.f32 %v727_v35, %v793_v42  ;;  %v848_v1 = vmax.f32 %v3771_v60, %v810_v0  ;;  %v3152_v60 = vld [vmem:[#allocation5 + $0x4] ss:$8 sps:$4 sm:$0xff]  }
 0x16a   : > { %v796_v49 = vmul.f32 0.2, %v733_v47  ;;  %v832_v52 = vmax.f32 %v729_v39, %v794_v46  ;;  %1846 = vmatprep.subr.bf16.mxu1 %v3152_v60 }
 0x16b   : > { %v833_v51 = vmax.f32 %v731_v43, %v795_v48  ;;  %v868_v62 = vpack.c.bf16 %v848_v1, %v848_v1 }
 0x16c   : > { %v834_v54 = vmax.f32 %v733_v47, %v796_v49 }
 0x16d   : > { %v859_v56 = vpack.c.bf16 %v833_v51, %v831_v50 }
 0x16e   : > { %v860_v57 = vpack.c.bf16 %v834_v54, %v832_v52 }
 0x170   : > { %2894 = vmatprep.mubr.msk.bf16.mxu1 %vm1013_vm2, %v860_v57 }
 0x171   : > { %1127 = vmatmul.mubr.bf16.gmra.mrb[36].mxu1 %v859_v56 }
 0x172   : > { %2895 = vmatprep.mubr.msk.bf16.mxu1 %vm1013_vm2, %v3740_v45  ;;  %v3146_v45 = vld [vmem:[#allocation3 + $0x94] ss:$8 sps:$4 sm:$0xff]  }
 0x173   : > { %1463 = vmatprep.subr.bf16.mxu0 %v3146_v45 }
 0x179   : > { %1137 = vmatmul.mubr.bf16.gmra.mrb[40].mxu1 %v3737_v41  ;;  %v867_v41 = vpack.c.bf16 %v847_v2, %v847_v2 }
 0x17a   : > { %2896 = vmatprep.mubr.msk.bf16.mxu1 %vm1013_vm2, %v3753_v21  ;;  %v3144_v21 = vld [vmem:[#allocation3 + $0x90] ss:$8 sps:$4 sm:$0xff]  }
 0x17b   : > { %1464 = vmatpush1.bf16.msra.mxu0 %v3144_v21 }
 0x181   : > { %1147 = vmatmul.mubr.bf16.gmra.mrb[44].mxu1 %v3750_v17  ;;  %v3149_v17 = vld [vmem:[#allocation3 + $0xa4] ss:$8 sps:$4 sm:$0xff]  }
 0x182   : > { %2897 = vmatprep.mubr.msk.bf16.mxu1 %vm1013_vm2, %v3768_v59  ;;  %1465 = vmatprep.subr.bf16.mxu0 %v3149_v17  ;;  %v3150_v59 = vld [vmem:[#allocation5] ss:$8 sps:$4 sm:$0xff]  }
 0x183   : > { %1466 = vmatpush1.bf16.msra.mxu0 %v3147_v3  ;;  %1847 = vmatpush1.bf16.msra.mxu1 %v3150_v59 }
 0x184   : > { %1848 = vmatprep.subr.bf16.mxu1 %v3155_v4 }
 0x187   : > { %1849 = vmatpush1.bf16.msra.mxu1 %v3153_v53 }
 0x189   : > { %1157 = vmatmul.mubr.bf16.gmra.mrb[48].mxu1 %v3765_v55  ;;  %v3158_v55 = vld [vmem:[#allocation5 + $0x24] ss:$8 sps:$4 sm:$0xff]  }
 0x18a   : > { %2898 = vmatprep.mubr.msk.bf16.mxu1 %vm1013_vm2, %v868_v62  ;;  %1850 = vmatprep.subr.bf16.mxu1 %v3158_v55 }
 0x18b   : > { %1851 = vmatpush1.bf16.msra.mxu1 %v3156_v5 }
 0x18c   : > { %1852 = vmatprep.subr.bf16.mxu1 %v3161_v6 }
 0x18f   : > { %1853 = vmatpush1.bf16.msra.mxu1 %v3159_v7 }
 0x190   : > { %1854 = vmatprep.subr.bf16.mxu1 %v3164_v8 }
 0x191   : > { %1167 = vmatmul.mubr.bf16.gmra.mrb[52].mxu1 %v867_v41 }
 0x193   : > { %1855 = vmatpush1.bf16.msra.mxu1 %v3162_v9 }
 0x194   : > { %1856 = vmatprep.subr.bf16.mxu1 %v3167_v10 }
 0x197   : > { %1857 = vmatpush1.bf16.msra.mxu1 %v3165_v11 }
 0x198   : > { %1858 = vmatprep.subr.bf16.mxu1 %v3170_v12 }
 0x19b   : > { %1859 = vmatpush1.bf16.msra.mxu1 %v3168_v13 }
 0x19c   : > { %1860 = vmatprep.subr.bf16.mxu1 %v3173_v14 }
 0x19f   : > { %1861 = vmatpush1.bf16.msra.mxu1 %v3171_v15 }
 0x1a0   : > { %1862 = vmatprep.subr.bf16.mxu1 %v3176_v16 }
 0x1a3   : > { %1863 = vmatpush1.bf16.msra.mxu1 %v3174_v18 }
 0x1a4   : > { %1864 = vmatprep.subr.bf16.mxu1 %v3179_v19 }
 0x1a7   : > { %1865 = vmatpush1.bf16.msra.mxu1 %v3177_v20 }
 0x21c   : > { %v1078_v25 = vpop.f32.mrb[16].mxu1 }
 0x21d   : > { %v1079_v26 = vadd.f32 %v1078_v25, %v3805_v23  ;;  %v1080_v27 = vpop.f32.mrb[17].mxu1 }
 0x21e   : > { %v1081_v28 = vadd.f32 %v1080_v27, %v3808_v24  ;;  %v1082_v29 = vpop.f32.mrb[18].mxu1 }
 0x21f   : > { %v1175_v30 = vmul.f32 0.2, %v1079_v26  ;;  %v1083_v31 = vadd.f32 %v1082_v29, %v3805_v23  ;;  %v1084_v32 = vpop.f32.mrb[19].mxu1 }
 0x220   : > { %v1176_v33 = vmul.f32 0.2, %v1081_v28  ;;  %v1085_v34 = vadd.f32 %v1084_v32, %v3808_v24 }
 0x221   : > { %v1177_v35 = vmul.f32 0.2, %v1083_v31  ;;  %v1213_v37 = vmax.f32 %v1079_v26, %v1175_v30 }
 0x222   : > { %v1178_v36 = vmul.f32 0.2, %v1085_v34  ;;  %v1214_v39 = vmax.f32 %v1081_v28, %v1176_v33 }
 0x223   : > { %v1215_v38 = vmax.f32 %v1083_v31, %v1177_v35 }
 0x224   : > { %v1216_v40 = vmax.f32 %v1085_v34, %v1178_v36  ;;  %v1088_v42 = vpop.f32.mrb[20].mxu1 }
 0x225   : > { %v1251_v43 = vpack.c.bf16 %v1215_v38, %v1213_v37  ;;  %v1089_v44 = vadd.f32 %v1088_v42, %v3805_v23  ;;  %v1090_v46 = vpop.f32.mrb[21].mxu1 }
 0x226   : > { %v1252_v47 = vpack.c.bf16 %v1216_v40, %v1214_v39  ;;  %v1091_v48 = vadd.f32 %v1090_v46, %v3808_v24  ;;  %v1092_v49 = vpop.f32.mrb[22].mxu1 }
 0x227   : > { %v1179_v50 = vmul.f32 0.2, %v1089_v44  ;;  %v1093_v51 = vadd.f32 %v1092_v49, %v3805_v23  ;;  %v1094_v52 = vpop.f32.mrb[23].mxu1 }
 0x228   : > { %v1180_v54 = vmul.f32 0.2, %v1091_v48  ;;  %v1095_v56 = vadd.f32 %v1094_v52, %v3808_v24  ;;  %2921 = vmatprep.mubr.msk.bf16.mxu0 %vm1013_vm2, %v1252_v47 }
 0x229   : > { %v1181_v57 = vmul.f32 0.2, %v1093_v51  ;;  %1478 = vmatmul.mubr.bf16.vlgmr.msra.gmra.mrb[24].mxu0 %v1251_v43  ;;  %v1217_v1 = vmax.f32 %v1089_v44, %v1179_v50 }
 0x22a   : > { %v1182_v0 = vmul.f32 0.2, %v1095_v56  ;;  %v1218_v62 = vmax.f32 %v1091_v48, %v1180_v54 }
 0x22b   : > { %v1219_v58 = vmax.f32 %v1093_v51, %v1181_v57 }
 0x22c   : > { %v1220_v2 = vmax.f32 %v1095_v56, %v1182_v0  ;;  %v1098_v41 = vpop.f32.mrb[24].mxu1 }
 0x22d   : > { %v1099_v45 = vadd.f32 %v1098_v41, %v3805_v23  ;;  %v1100_v21 = vpop.f32.mrb[25].mxu1  ;;  %v1253_v17 = vpack.c.bf16 %v1219_v58, %v1217_v1 }
 0x22e   : > { %v1254_v3 = vpack.c.bf16 %v1220_v2, %v1218_v62  ;;  %v1101_v59 = vadd.f32 %v1100_v21, %v3808_v24  ;;  %v1102_v60 = vpop.f32.mrb[26].mxu1 }
 0x22f   : > { %v1183_v4 = vmul.f32 0.2, %v1099_v45  ;;  %v1103_v53 = vadd.f32 %v1102_v60, %v3805_v23  ;;  %v1104_v55 = vpop.f32.mrb[27].mxu1 }
 0x230   : > { %v1184_v5 = vmul.f32 0.2, %v1101_v59  ;;  %v1105_v6 = vadd.f32 %v1104_v55, %v3808_v24  ;;  %2922 = vmatprep.mubr.msk.bf16.mxu0 %vm1013_vm2, %v1254_v3 }
 0x231   : > { %v1185_v7 = vmul.f32 0.2, %v1103_v53  ;;  %1488 = vmatmul.mubr.bf16.gmra.mrb[28].mxu0 %v1253_v17  ;;  %v1221_v9 = vmax.f32 %v1099_v45, %v1183_v4 }
 0x232   : > { %v1186_v8 = vmul.f32 0.2, %v1105_v6  ;;  %v1222_v11 = vmax.f32 %v1101_v59, %v1184_v5 }
 0x233   : > { %v1223_v10 = vmax.f32 %v1103_v53, %v1185_v7 }
 0x234   : > { %v1224_v12 = vmax.f32 %v1105_v6, %v1186_v8  ;;  %v1108_v13 = vpop.f32.mrb[28].mxu1 }
 0x235   : > { %v1109_v14 = vadd.f32 %v1108_v13, %v3805_v23  ;;  %v1110_v15 = vpop.f32.mrb[29].mxu1  ;;  %v1255_v16 = vpack.c.bf16 %v1223_v10, %v1221_v9 }
 0x236   : > { %v1256_v18 = vpack.c.bf16 %v1224_v12, %v1222_v11  ;;  %v1111_v19 = vadd.f32 %v1110_v15, %v3808_v24  ;;  %v1112_v20 = vpop.f32.mrb[30].mxu1 }
 0x237   : > { %v1187_v22 = vmul.f32 0.2, %v1109_v14  ;;  %v1113_v25 = vadd.f32 %v1112_v20, %v3805_v23  ;;  %v1114_v26 = vpop.f32.mrb[31].mxu1 }
 0x238   : > { %v1188_v27 = vmul.f32 0.2, %v1111_v19  ;;  %v1115_v28 = vadd.f32 %v1114_v26, %v3808_v24  ;;  %2923 = vmatprep.mubr.msk.bf16.mxu0 %vm1013_vm2, %v1256_v18 }
 0x239   : > { %v1189_v29 = vmul.f32 0.2, %v1113_v25  ;;  %1498 = vmatmul.mubr.bf16.gmra.mrb[32].mxu0 %v1255_v16  ;;  %v1225_v31 = vmax.f32 %v1109_v14, %v1187_v22 }
 0x23a   : > { %v1190_v30 = vmul.f32 0.2, %v1115_v28  ;;  %v1226_v33 = vmax.f32 %v1111_v19, %v1188_v27 }
 0x23b   : > { %v1227_v32 = vmax.f32 %v1113_v25, %v1189_v29 }
 0x23c   : > { %v1228_v34 = vmax.f32 %v1115_v28, %v1190_v30  ;;  %v1118_v35 = vpop.f32.mrb[32].mxu1 }
 0x23d   : > { %v1119_v36 = vadd.f32 %v1118_v35, %v3805_v23  ;;  %v1120_v37 = vpop.f32.mrb[33].mxu1  ;;  %v1257_v38 = vpack.c.bf16 %v1227_v32, %v1225_v31 }
 0x23e   : > { %v1258_v39 = vpack.c.bf16 %v1228_v34, %v1226_v33  ;;  %v1121_v40 = vadd.f32 %v1120_v37, %v3808_v24  ;;  %v1122_v42 = vpop.f32.mrb[34].mxu1 }
 0x23f   : > { %v1191_v43 = vmul.f32 0.2, %v1119_v36  ;;  %v1123_v44 = vadd.f32 %v1122_v42, %v3805_v23  ;;  %v1124_v46 = vpop.f32.mrb[35].mxu1 }
 0x240   : > { %v1192_v47 = vmul.f32 0.2, %v1121_v40  ;;  %v1125_v48 = vadd.f32 %v1124_v46, %v3808_v24  ;;  %2924 = vmatprep.mubr.msk.bf16.mxu0 %vm1013_vm2, %v1258_v39 }
 0x241   : > { %v1193_v49 = vmul.f32 0.2, %v1123_v44  ;;  %1508 = vmatmul.mubr.bf16.gmra.mrb[36].mxu0 %v1257_v38  ;;  %v1229_v51 = vmax.f32 %v1119_v36, %v1191_v43 }
 0x242   : > { %v1194_v50 = vmul.f32 0.2, %v1125_v48  ;;  %v1230_v54 = vmax.f32 %v1121_v40, %v1192_v47 }
 0x243   : > { %v1231_v52 = vmax.f32 %v1123_v44, %v1193_v49 }
 0x244   : > { %v1232_v56 = vmax.f32 %v1125_v48, %v1194_v50  ;;  %v1128_v57 = vpop.f32.mrb[36].mxu1 }
 0x245   : > { %v1129_v0 = vadd.f32 %v1128_v57, %v3805_v23  ;;  %v1130_v1 = vpop.f32.mrb[37].mxu1  ;;  %v1259_v58 = vpack.c.bf16 %v1231_v52, %v1229_v51 }
 0x246   : > { %v1260_v62 = vpack.c.bf16 %v1232_v56, %v1230_v54  ;;  %v1131_v2 = vadd.f32 %v1130_v1, %v3808_v24  ;;  %v1132_v41 = vpop.f32.mrb[38].mxu1 }
 0x247   : > { %v1195_v45 = vmul.f32 0.2, %v1129_v0  ;;  %v1133_v21 = vadd.f32 %v1132_v41, %v3805_v23  ;;  %v1134_v17 = vpop.f32.mrb[39].mxu1 }
 0x248   : > { %v1196_v3 = vmul.f32 0.2, %v1131_v2  ;;  %v1135_v59 = vadd.f32 %v1134_v17, %v3808_v24  ;;  %2925 = vmatprep.mubr.msk.bf16.mxu0 %vm1013_vm2, %v1260_v62 }
 0x249   : > { %v1197_v60 = vmul.f32 0.2, %v1133_v21  ;;  %1518 = vmatmul.mubr.bf16.gmra.mrb[40].mxu0 %v1259_v58  ;;  %v1233_v53 = vmax.f32 %v1129_v0, %v1195_v45 }
 0x24a   : > { %v1198_v4 = vmul.f32 0.2, %v1135_v59  ;;  %v1234_v5 = vmax.f32 %v1131_v2, %v1196_v3 }
 0x24b   : > { %v1235_v55 = vmax.f32 %v1133_v21, %v1197_v60 }
 0x24c   : > { %v1236_v6 = vmax.f32 %v1135_v59, %v1198_v4  ;;  %v1138_v7 = vpop.f32.mrb[40].mxu1 }
 0x24d   : > { %v1139_v8 = vadd.f32 %v1138_v7, %v3805_v23  ;;  %v1140_v9 = vpop.f32.mrb[41].mxu1  ;;  %v1261_v10 = vpack.c.bf16 %v1235_v55, %v1233_v53 }
 0x24e   : > { %v1262_v11 = vpack.c.bf16 %v1236_v6, %v1234_v5  ;;  %v1141_v12 = vadd.f32 %v1140_v9, %v3808_v24  ;;  %v1142_v13 = vpop.f32.mrb[42].mxu1 }
 0x24f   : > { %v1199_v14 = vmul.f32 0.2, %v1139_v8  ;;  %v1143_v15 = vadd.f32 %v1142_v13, %v3805_v23  ;;  %v1144_v16 = vpop.f32.mrb[43].mxu1 }
 0x250   : > { %v1200_v18 = vmul.f32 0.2, %v1141_v12  ;;  %v1145_v19 = vadd.f32 %v1144_v16, %v3808_v24  ;;  %2926 = vmatprep.mubr.msk.bf16.mxu0 %vm1013_vm2, %v1262_v11  ;;  %v3183_v16 = vld [vmem:[#allocation7] ss:$8 sps:$4 sm:$0xff]  }
 0x251   : > { %v1201_v20 = vmul.f32 0.2, %v1143_v15  ;;  %1528 = vmatmul.mubr.bf16.gmra.mrb[44].mxu0 %v1261_v10  ;;  %v1237_v25 = vmax.f32 %v1139_v8, %v1199_v14 }
 0x252   : > { %v1202_v22 = vmul.f32 0.2, %v1145_v19  ;;  %v1238_v27 = vmax.f32 %v1141_v12, %v1200_v18  ;;  %v3188_v18 = vld [vmem:[#allocation7 + $0x14] ss:$8 sps:$4 sm:$0xff]  }
 0x253   : > { %v1239_v26 = vmax.f32 %v1143_v15, %v1201_v20  ;;  %v3180_v15 = vld [vmem:[#allocation5 + $0xa0] ss:$8 sps:$4 sm:$0xff]   ;;  %v3191_v20 = vld [vmem:[#allocation7 + $0x24] ss:$8 sps:$4 sm:$0xff]  }
 0x254   : > { %v1240_v28 = vmax.f32 %v1145_v19, %v1202_v22  ;;  %v1148_v29 = vpop.f32.mrb[44].mxu1  ;;  %v3186_v19 = vld [vmem:[#allocation7 + $0x10] ss:$8 sps:$4 sm:$0xff]   ;;  %v3189_v22 = vld [vmem:[#allocation7 + $0x20] ss:$8 sps:$4 sm:$0xff]  }
 0x255   : > { %v1149_v30 = vadd.f32 %v1148_v29, %v3805_v23  ;;  %v1150_v31 = vpop.f32.mrb[45].mxu1  ;;  %v1263_v32 = vpack.c.bf16 %v1239_v26, %v1237_v25  ;;  %v3194_v25 = vld [vmem:[#allocation7 + $0x34] ss:$8 sps:$4 sm:$0xff]   ;;  %v3192_v26 = vld [vmem:[#allocation7 + $0x30] ss:$8 sps:$4 sm:$0xff]  }
 0x256   : > { %v1264_v33 = vpack.c.bf16 %v1240_v28, %v1238_v27  ;;  %v1151_v34 = vadd.f32 %v1150_v31, %v3808_v24  ;;  %v1152_v35 = vpop.f32.mrb[46].mxu1  ;;  %v3197_v27 = vld [vmem:[#allocation7 + $0x44] ss:$8 sps:$4 sm:$0xff]   ;;  %v3195_v28 = vld [vmem:[#allocation7 + $0x40] ss:$8 sps:$4 sm:$0xff]  }
 0x257   : > { %v1203_v36 = vmul.f32 0.2, %v1149_v30  ;;  %v1153_v37 = vadd.f32 %v1152_v35, %v3805_v23  ;;  %v1154_v38 = vpop.f32.mrb[47].mxu1  ;;  %v3200_v29 = vld [vmem:[#allocation7 + $0x54] ss:$8 sps:$4 sm:$0xff]  }
 0x258   : > { %v1204_v39 = vmul.f32 0.2, %v1151_v34  ;;  %v1155_v40 = vadd.f32 %v1154_v38, %v3808_v24  ;;  %2927 = vmatprep.mubr.msk.bf16.mxu0 %vm1013_vm2, %v1264_v33  ;;  %v3203_v31 = vld [vmem:[#allocation7 + $0x64] ss:$8 sps:$4 sm:$0xff]   ;;  %v3206_v33 = vld [vmem:[#allocation7 + $0x74] ss:$8 sps:$4 sm:$0xff]  }
 0x259   : > { %v1205_v42 = vmul.f32 0.2, %v1153_v37  ;;  %1538 = vmatmul.mubr.bf16.gmra.mrb[48].mxu0 %v1263_v32  ;;  %v1241_v44 = vmax.f32 %v1149_v30, %v1203_v36  ;;  %v3198_v30 = vld [vmem:[#allocation7 + $0x50] ss:$8 sps:$4 sm:$0xff]   ;;  %v3201_v32 = vld [vmem:[#allocation7 + $0x60] ss:$8 sps:$4 sm:$0xff]  }
 0x25a   : > { %v1206_v43 = vmul.f32 0.2, %v1155_v40  ;;  %v1242_v47 = vmax.f32 %v1151_v34, %v1204_v39  ;;  %v3204_v34 = vld [vmem:[#allocation7 + $0x70] ss:$8 sps:$4 sm:$0xff]   ;;  %v3209_v35 = vld [vmem:[#allocation7 + $0x84] ss:$8 sps:$4 sm:$0xff]  }
 0x25b   : > { %v1243_v46 = vmax.f32 %v1153_v37, %v1205_v42  ;;  %v3207_v36 = vld [vmem:[#allocation7 + $0x80] ss:$8 sps:$4 sm:$0xff]   ;;  %v3212_v37 = vld [vmem:[#allocation7 + $0x94] ss:$8 sps:$4 sm:$0xff]   ;;  %v3210_v38 = vld [vmem:[#allocation7 + $0x90] ss:$8 sps:$4 sm:$0xff]  }
 0x25c   : > { %v1244_v48 = vmax.f32 %v1155_v40, %v1206_v43  ;;  %v1158_v49 = vpop.f32.mrb[48].mxu1  ;;  %v1293_v39 = vld [vmem:[%s4159_s6] sm:$0x3] }
 0x25d   : > { %v1159_v50 = vadd.f32 %v1158_v49, %v3805_v23  ;;  %v1160_v51 = vpop.f32.mrb[49].mxu1  ;;  %v1265_v52 = vpack.c.bf16 %v1243_v46, %v1241_v44  ;;  %v3862_v40 = vrot.slane %v1293_v39, %v3714_v61  ;;  %v3865_v42 = vrot.slane %v1293_v39, %v3719_v63 }
 0x25e   : > { %v1266_v54 = vpack.c.bf16 %v1244_v48, %v1242_v47  ;;  %v1161_v56 = vadd.f32 %v1160_v51, %v3808_v24  ;;  %v1162_v57 = vpop.f32.mrb[50].mxu1 }
 0x25f   : > { %v1207_v0 = vmul.f32 0.2, %v1159_v50  ;;  %v1163_v1 = vadd.f32 %v1162_v57, %v3805_v23  ;;  %v1164_v58 = vpop.f32.mrb[51].mxu1 }
 0x260   : > { %v1208_v62 = vmul.f32 0.2, %v1161_v56  ;;  %v1165_v2 = vadd.f32 %v1164_v58, %v3808_v24  ;;  %2928 = vmatprep.mubr.msk.bf16.mxu0 %vm1013_vm2, %v1266_v54 }
 0x261   : > { %v1209_v41 = vmul.f32 0.2, %v1163_v1  ;;  %1548 = vmatmul.mubr.bf16.gmra.mrb[52].mxu0 %v1265_v52  ;;  %v1245_v21 = vmax.f32 %v1159_v50, %v1207_v0 }
 0x262   : > { %v1210_v45 = vmul.f32 0.2, %v1165_v2  ;;  %v1246_v3 = vmax.f32 %v1161_v56, %v1208_v62 }
 0x263   : > { %v1247_v17 = vmax.f32 %v1163_v1, %v1209_v41 }
 0x264   : > { %v1248_v59 = vmax.f32 %v1165_v2, %v1210_v45  ;;  %v1168_v60 = vpop.f32.mrb[52].mxu1 }
 0x265   : > { %v1169_v4 = vadd.f32 %v1168_v60, %v3805_v23  ;;  %v1170_v53 = vpop.f32.mrb[53].mxu1  ;;  %v1267_v55 = vpack.c.bf16 %v1247_v17, %v1245_v21  ;;  %v3182_v23 = vld [vmem:[#allocation5 + $0xa4] ss:$8 sps:$4 sm:$0xff]  }
 0x266   : > { %v1268_v5 = vpack.c.bf16 %v1248_v59, %v1246_v3  ;;  %v1171_v6 = vadd.f32 %v1170_v53, %v3808_v24  ;;  %v1172_v7 = vpop.f32.mrb[54].mxu1  ;;  %1866 = vmatprep.subr.bf16.mxu1 %v3182_v23  ;;  %v3185_v24 = vld [vmem:[#allocation7 + $0x4] ss:$8 sps:$4 sm:$0xff]  }
 0x267   : > { %v1211_v8 = vmul.f32 0.2, %v1169_v4  ;;  %v1173_v9 = vpop.f32.mrb[55].mxu1  ;;  %1867 = vmatpush1.bf16.msra.mxu1 %v3180_v15  ;;  %2247 = vmatprep.subr.bf16.mxu0 %v3185_v24 }
 0x268   : > { %v1212_v10 = vmul.f32 0.2, %v1171_v6  ;;  %2929 = vmatprep.mubr.msk.bf16.mxu0 %vm1013_vm2, %v1268_v5  ;;  %2248 = vmatpush1.bf16.msra.mxu0 %v3183_v16 }
 0x269   : > { %1558 = vmatmul.mubr.bf16.gmra.mrb[56].mxu0 %v1267_v55  ;;  %v1249_v12 = vmax.f32 %v1169_v4, %v1211_v8  ;;  %2249 = vmatprep.subr.bf16.mxu0 %v3188_v18 }
 0x26a   : > { %v1250_v11 = vmax.f32 %v1171_v6, %v1212_v10 }
 0x26b   : > { %v1269_v14 = vpack.c.bf16 %v1249_v12, %v1249_v12 }
 0x26c   : > { %v1270_v13 = vpack.c.bf16 %v1250_v11, %v1250_v11  ;;  %2250 = vmatpush1.bf16.msra.mxu0 %v3186_v19 }
 0x26d   : > { %2251 = vmatprep.subr.bf16.mxu0 %v3191_v20 }
 0x26e   : > { %2930 = vmatprep.mubr.msk.bf16.mxu0 %vm1013_vm2, %v1270_v13 }
 0x270   : > { %2252 = vmatpush1.bf16.msra.mxu0 %v3189_v22 }
 0x271   : > { %1568 = vmatmul.mubr.bf16.gmra.mrb[60].mxu0 %v1269_v14  ;;  %2253 = vmatprep.subr.bf16.mxu0 %v3194_v25 }
 0x274   : > { %2254 = vmatpush1.bf16.msra.mxu0 %v3192_v26 }
 0x275   : > { %2255 = vmatprep.subr.bf16.mxu0 %v3197_v27 }
 0x278   : > { %2256 = vmatpush1.bf16.msra.mxu0 %v3195_v28 }
 0x279   : > { %2257 = vmatprep.subr.bf16.mxu0 %v3200_v29 }
 0x27c   : > { %2258 = vmatpush1.bf16.msra.mxu0 %v3198_v30 }
 0x27d   : > { %2259 = vmatprep.subr.bf16.mxu0 %v3203_v31 }
 0x280   : > { %2260 = vmatpush1.bf16.msra.mxu0 %v3201_v32 }
 0x281   : > { %2261 = vmatprep.subr.bf16.mxu0 %v3206_v33 }
 0x284   : > { %2262 = vmatpush1.bf16.msra.mxu0 %v3204_v34 }
 0x285   : > { %2263 = vmatprep.subr.bf16.mxu0 %v3209_v35 }
 0x288   : > { %2264 = vmatpush1.bf16.msra.mxu0 %v3207_v36 }
 0x289   : > { %2265 = vmatprep.subr.bf16.mxu0 %v3212_v37 }
 0x28c   : > { %2266 = vmatpush1.bf16.msra.mxu0 %v3210_v38 }
 0x2fc   : > { %v1479_v43 = vpop.f32.mrb[24].mxu0 }
 0x2fd   : > { %v1480_v44 = vadd.f32 %v1479_v43, %v3862_v40  ;;  %v1481_v46 = vpop.f32.mrb[25].mxu0 }
 0x2fe   : > { %v1482_v47 = vadd.f32 %v1481_v46, %v3865_v42  ;;  %v1483_v48 = vpop.f32.mrb[26].mxu0 }
 0x2ff   : > { %v1576_v49 = vmul.f32 0.2, %v1480_v44  ;;  %v1484_v50 = vadd.f32 %v1483_v48, %v3862_v40  ;;  %v1485_v51 = vpop.f32.mrb[27].mxu0 }
 0x300   : > { %v1577_v52 = vmul.f32 0.2, %v1482_v47  ;;  %v1486_v54 = vadd.f32 %v1485_v51, %v3865_v42 }
 0x301   : > { %v1578_v56 = vmul.f32 0.2, %v1484_v50  ;;  %v1614_v0 = vmax.f32 %v1480_v44, %v1576_v49 }
 0x302   : > { %v1579_v57 = vmul.f32 0.2, %v1486_v54  ;;  %v1615_v58 = vmax.f32 %v1482_v47, %v1577_v52 }
 0x303   : > { %v1616_v1 = vmax.f32 %v1484_v50, %v1578_v56 }
 0x304   : > { %v1617_v62 = vmax.f32 %v1486_v54, %v1579_v57  ;;  %v1489_v2 = vpop.f32.mrb[28].mxu0 }
 0x305   : > { %v1652_v41 = vpack.c.bf16 %v1616_v1, %v1614_v0  ;;  %v1490_v45 = vadd.f32 %v1489_v2, %v3862_v40  ;;  %v1491_v21 = vpop.f32.mrb[29].mxu0 }
 0x306   : > { %v1653_v17 = vpack.c.bf16 %v1617_v62, %v1615_v58  ;;  %v1492_v3 = vadd.f32 %v1491_v21, %v3865_v42  ;;  %v1493_v59 = vpop.f32.mrb[30].mxu0 }
 0x307   : > { %v1580_v60 = vmul.f32 0.2, %v1490_v45  ;;  %v1494_v4 = vadd.f32 %v1493_v59, %v3862_v40  ;;  %v1495_v53 = vpop.f32.mrb[31].mxu0 }
 0x308   : > { %v1581_v55 = vmul.f32 0.2, %v1492_v3  ;;  %v1496_v5 = vadd.f32 %v1495_v53, %v3865_v42  ;;  %2953 = vmatprep.mubr.msk.bf16.mxu1 %vm1013_vm2, %v1653_v17 }
 0x309   : > { %v1582_v6 = vmul.f32 0.2, %v1494_v4  ;;  %1879 = vmatmul.mubr.bf16.vlgmr.msra.gmra.mrb[56].mxu1 %v1652_v41  ;;  %v1618_v8 = vmax.f32 %v1490_v45, %v1580_v60 }
 0x30a   : > { %v1583_v7 = vmul.f32 0.2, %v1496_v5  ;;  %v1619_v10 = vmax.f32 %v1492_v3, %v1581_v55 }
 0x30b   : > { %v1620_v9 = vmax.f32 %v1494_v4, %v1582_v6 }
 0x30c   : > { %v1621_v11 = vmax.f32 %v1496_v5, %v1583_v7  ;;  %v1499_v12 = vpop.f32.mrb[32].mxu0 }
 0x30d   : > { %v1500_v13 = vadd.f32 %v1499_v12, %v3862_v40  ;;  %v1501_v14 = vpop.f32.mrb[33].mxu0  ;;  %v1654_v23 = vpack.c.bf16 %v1620_v9, %v1618_v8 }
 0x30e   : > { %v1655_v15 = vpack.c.bf16 %v1621_v11, %v1619_v10  ;;  %v1502_v16 = vadd.f32 %v1501_v14, %v3865_v42  ;;  %v1503_v24 = vpop.f32.mrb[34].mxu0 }
 0x30f   : > { %v1584_v18 = vmul.f32 0.2, %v1500_v13  ;;  %v1504_v19 = vadd.f32 %v1503_v24, %v3862_v40  ;;  %v1505_v20 = vpop.f32.mrb[35].mxu0 }
 0x310   : > { %v1585_v22 = vmul.f32 0.2, %v1502_v16  ;;  %v1506_v25 = vadd.f32 %v1505_v20, %v3865_v42  ;;  %2954 = vmatprep.mubr.msk.bf16.mxu1 %vm1013_vm2, %v1655_v15 }
 0x311   : > { %v1586_v26 = vmul.f32 0.2, %v1504_v19  ;;  %1889 = vmatmul.mubr.bf16.gmra.mrb[60].mxu1 %v1654_v23  ;;  %v1622_v28 = vmax.f32 %v1500_v13, %v1584_v18 }
 0x312   : > { %v1587_v27 = vmul.f32 0.2, %v1506_v25  ;;  %v1623_v30 = vmax.f32 %v1502_v16, %v1585_v22 }
 0x313   : > { %v1624_v29 = vmax.f32 %v1504_v19, %v1586_v26 }
 0x314   : > { %v1625_v31 = vmax.f32 %v1506_v25, %v1587_v27  ;;  %v1509_v32 = vpop.f32.mrb[36].mxu0 }
 0x315   : > { %v1510_v33 = vadd.f32 %v1509_v32, %v3862_v40  ;;  %v1511_v34 = vpop.f32.mrb[37].mxu0  ;;  %v1656_v35 = vpack.c.bf16 %v1624_v29, %v1622_v28 }
 0x316   : > { %v1657_v36 = vpack.c.bf16 %v1625_v31, %v1623_v30  ;;  %v1512_v37 = vadd.f32 %v1511_v34, %v3865_v42  ;;  %v1513_v38 = vpop.f32.mrb[38].mxu0 }
 0x317   : > { %v1588_v39 = vmul.f32 0.2, %v1510_v33  ;;  %v1514_v43 = vadd.f32 %v1513_v38, %v3862_v40  ;;  %v1515_v44 = vpop.f32.mrb[39].mxu0 }
 0x318   : > { %v1589_v46 = vmul.f32 0.2, %v1512_v37  ;;  %v1516_v47 = vadd.f32 %v1515_v44, %v3865_v42  ;;  %2955 = vmatprep.mubr.msk.bf16.mxu1 %vm1013_vm2, %v1657_v36 }
 0x319   : > { %v1590_v48 = vmul.f32 0.2, %v1514_v43  ;;  %1899 = vmatmul.mubr.bf16.gmra.mrb[64].mxu1 %v1656_v35  ;;  %v1626_v50 = vmax.f32 %v1510_v33, %v1588_v39 }
 0x31a   : > { %v1591_v49 = vmul.f32 0.2, %v1516_v47  ;;  %v1627_v52 = vmax.f32 %v1512_v37, %v1589_v46 }
 0x31b   : > { %v1628_v51 = vmax.f32 %v1514_v43, %v1590_v48 }
 0x31c   : > { %v1629_v54 = vmax.f32 %v1516_v47, %v1591_v49  ;;  %v1519_v56 = vpop.f32.mrb[40].mxu0 }
 0x31d   : > { %v1520_v57 = vadd.f32 %v1519_v56, %v3862_v40  ;;  %v1521_v0 = vpop.f32.mrb[41].mxu0  ;;  %v1658_v1 = vpack.c.bf16 %v1628_v51, %v1626_v50 }
 0x31e   : > { %v1659_v58 = vpack.c.bf16 %v1629_v54, %v1627_v52  ;;  %v1522_v62 = vadd.f32 %v1521_v0, %v3865_v42  ;;  %v1523_v2 = vpop.f32.mrb[42].mxu0 }
 0x31f   : > { %v1592_v41 = vmul.f32 0.2, %v1520_v57  ;;  %v1524_v45 = vadd.f32 %v1523_v2, %v3862_v40  ;;  %v1525_v21 = vpop.f32.mrb[43].mxu0 }
 0x320   : > { %v1593_v17 = vmul.f32 0.2, %v1522_v62  ;;  %v1526_v3 = vadd.f32 %v1525_v21, %v3865_v42  ;;  %2956 = vmatprep.mubr.msk.bf16.mxu1 %vm1013_vm2, %v1659_v58 }
 0x321   : > { %v1594_v59 = vmul.f32 0.2, %v1524_v45  ;;  %1909 = vmatmul.mubr.bf16.gmra.mrb[68].mxu1 %v1658_v1  ;;  %v1630_v4 = vmax.f32 %v1520_v57, %v1592_v41 }
 0x322   : > { %v1595_v60 = vmul.f32 0.2, %v1526_v3  ;;  %v1631_v55 = vmax.f32 %v1522_v62, %v1593_v17 }
 0x323   : > { %v1632_v53 = vmax.f32 %v1524_v45, %v1594_v59 }
 0x324   : > { %v1633_v5 = vmax.f32 %v1526_v3, %v1595_v60  ;;  %v1529_v6 = vpop.f32.mrb[44].mxu0 }
 0x325   : > { %v1530_v7 = vadd.f32 %v1529_v6, %v3862_v40  ;;  %v1531_v8 = vpop.f32.mrb[45].mxu0  ;;  %v1660_v9 = vpack.c.bf16 %v1632_v53, %v1630_v4 }
 0x326   : > { %v1661_v10 = vpack.c.bf16 %v1633_v5, %v1631_v55  ;;  %v1532_v11 = vadd.f32 %v1531_v8, %v3865_v42  ;;  %v1533_v12 = vpop.f32.mrb[46].mxu0 }
 0x327   : > { %v1596_v13 = vmul.f32 0.2, %v1530_v7  ;;  %v1534_v14 = vadd.f32 %v1533_v12, %v3862_v40  ;;  %v1535_v23 = vpop.f32.mrb[47].mxu0 }
 0x328   : > { %v1597_v15 = vmul.f32 0.2, %v1532_v11  ;;  %v1536_v16 = vadd.f32 %v1535_v23, %v3865_v42  ;;  %2957 = vmatprep.mubr.msk.bf16.mxu1 %vm1013_vm2, %v1661_v10 }
 0x329   : > { %v1598_v24 = vmul.f32 0.2, %v1534_v14  ;;  %1919 = vmatmul.mubr.bf16.gmra.mrb[72].mxu1 %v1660_v9  ;;  %v1634_v19 = vmax.f32 %v1530_v7, %v1596_v13 }
 0x32a   : > { %v1599_v18 = vmul.f32 0.2, %v1536_v16  ;;  %v1635_v22 = vmax.f32 %v1532_v11, %v1597_v15 }
 0x32b   : > { %v1636_v20 = vmax.f32 %v1534_v14, %v1598_v24 }
 0x32c   : > { %v1637_v25 = vmax.f32 %v1536_v16, %v1599_v18  ;;  %v1539_v26 = vpop.f32.mrb[48].mxu0 }
 0x32d   : > { %v1540_v27 = vadd.f32 %v1539_v26, %v3862_v40  ;;  %v1541_v28 = vpop.f32.mrb[49].mxu0  ;;  %v1662_v29 = vpack.c.bf16 %v1636_v20, %v1634_v19 }
 0x32e   : > { %v1663_v30 = vpack.c.bf16 %v1637_v25, %v1635_v22  ;;  %v1542_v31 = vadd.f32 %v1541_v28, %v3865_v42  ;;  %v1543_v32 = vpop.f32.mrb[50].mxu0 }
 0x32f   : > { %v1600_v33 = vmul.f32 0.2, %v1540_v27  ;;  %v1544_v34 = vadd.f32 %v1543_v32, %v3862_v40  ;;  %v1545_v35 = vpop.f32.mrb[51].mxu0 }
 0x330   : > { %v1601_v36 = vmul.f32 0.2, %v1542_v31  ;;  %v1546_v37 = vadd.f32 %v1545_v35, %v3865_v42  ;;  %2958 = vmatprep.mubr.msk.bf16.mxu1 %vm1013_vm2, %v1663_v30 }
 0x331   : > { %v1602_v38 = vmul.f32 0.2, %v1544_v34  ;;  %1929 = vmatmul.mubr.bf16.gmra.mrb[76].mxu1 %v1662_v29  ;;  %v1638_v43 = vmax.f32 %v1540_v27, %v1600_v33 }
 0x332   : > { %v1603_v39 = vmul.f32 0.2, %v1546_v37  ;;  %v1639_v46 = vmax.f32 %v1542_v31, %v1601_v36 }
 0x333   : > { %v1640_v44 = vmax.f32 %v1544_v34, %v1602_v38  ;;  %v3213_v34 = vld [vmem:[#allocation7 + $0xa0] ss:$8 sps:$4 sm:$0xff]  }
 0x334   : > { %v1641_v47 = vmax.f32 %v1546_v37, %v1603_v39  ;;  %v1549_v48 = vpop.f32.mrb[52].mxu0 }
 0x335   : > { %v1550_v49 = vadd.f32 %v1549_v48, %v3862_v40  ;;  %v1551_v50 = vpop.f32.mrb[53].mxu0  ;;  %v1664_v51 = vpack.c.bf16 %v1640_v44, %v1638_v43 }
 0x336   : > { %v1665_v52 = vpack.c.bf16 %v1641_v47, %v1639_v46  ;;  %v1552_v54 = vadd.f32 %v1551_v50, %v3865_v42  ;;  %v1553_v56 = vpop.f32.mrb[54].mxu0 }
 0x337   : > { %v1604_v57 = vmul.f32 0.2, %v1550_v49  ;;  %v1554_v0 = vadd.f32 %v1553_v56, %v3862_v40  ;;  %v1555_v1 = vpop.f32.mrb[55].mxu0 }
 0x338   : > { %v1605_v58 = vmul.f32 0.2, %v1552_v54  ;;  %v1556_v62 = vadd.f32 %v1555_v1, %v3865_v42  ;;  %2959 = vmatprep.mubr.msk.bf16.mxu1 %vm1013_vm2, %v1665_v52 }
 0x339   : > { %v1606_v2 = vmul.f32 0.2, %v1554_v0  ;;  %1939 = vmatmul.mubr.bf16.gmra.mrb[80].mxu1 %v1664_v51  ;;  %v1642_v45 = vmax.f32 %v1550_v49, %v1604_v57 }
 0x33a   : > { %v1607_v41 = vmul.f32 0.2, %v1556_v62  ;;  %v1643_v17 = vmax.f32 %v1552_v54, %v1605_v58 }
 0x33b   : > { %v1644_v21 = vmax.f32 %v1554_v0, %v1606_v2 }
 0x33c   : > { %v1645_v3 = vmax.f32 %v1556_v62, %v1607_v41  ;;  %v1559_v59 = vpop.f32.mrb[56].mxu0 }
 0x33d   : > { %v1560_v60 = vadd.f32 %v1559_v59, %v3862_v40  ;;  %v1561_v4 = vpop.f32.mrb[57].mxu0  ;;  %v1666_v53 = vpack.c.bf16 %v1644_v21, %v1642_v45 }
 0x33e   : > { %v1667_v55 = vpack.c.bf16 %v1645_v3, %v1643_v17  ;;  %v1562_v5 = vadd.f32 %v1561_v4, %v3865_v42  ;;  %v1563_v6 = vpop.f32.mrb[58].mxu0 }
 0x33f   : > { %v1608_v7 = vmul.f32 0.2, %v1560_v60  ;;  %v1564_v8 = vadd.f32 %v1563_v6, %v3862_v40  ;;  %v1565_v9 = vpop.f32.mrb[59].mxu0 }
 0x340   : > { %v1609_v10 = vmul.f32 0.2, %v1562_v5  ;;  %v1566_v11 = vadd.f32 %v1565_v9, %v3865_v42  ;;  %2960 = vmatprep.mubr.msk.bf16.mxu1 %vm1013_vm2, %v1667_v55 }
 0x341   : > { %v1610_v12 = vmul.f32 0.2, %v1564_v8  ;;  %1949 = vmatmul.mubr.bf16.gmra.mrb[84].mxu1 %v1666_v53  ;;  %v1646_v14 = vmax.f32 %v1560_v60, %v1608_v7 }
 0x342   : > { %v1611_v13 = vmul.f32 0.2, %v1566_v11  ;;  %v1647_v15 = vmax.f32 %v1562_v5, %v1609_v10 }
 0x343   : > { %v1648_v23 = vmax.f32 %v1564_v8, %v1610_v12 }
 0x344   : > { %v1649_v16 = vmax.f32 %v1566_v11, %v1611_v13  ;;  %v1569_v24 = vpop.f32.mrb[60].mxu0 }
 0x345   : > { %v1570_v18 = vadd.f32 %v1569_v24, %v3862_v40  ;;  %v1571_v19 = vpop.f32.mrb[61].mxu0  ;;  %v1668_v20 = vpack.c.bf16 %v1648_v23, %v1646_v14  ;;  %v3215_v40 = vld [vmem:[#allocation7 + $0xa4] ss:$8 sps:$4 sm:$0xff]  }
 0x346   : > { %v1669_v22 = vpack.c.bf16 %v1649_v16, %v1647_v15  ;;  %v1572_v25 = vadd.f32 %v1571_v19, %v3865_v42  ;;  %v1573_v26 = vpop.f32.mrb[62].mxu0  ;;  %2267 = vmatprep.subr.bf16.mxu0 %v3215_v40  ;;  %v1694_v42 = vld [vmem:[%s4161_s8] sm:$0x3] }
 0x347   : > { %v1612_v27 = vmul.f32 0.2, %v1570_v18  ;;  %v1574_v28 = vpop.f32.mrb[63].mxu0  ;;  %2268 = vmatpush1.bf16.msra.mxu0 %v3213_v34  ;;  %v3919_v35 = vrot.slane %v1694_v42, %v3714_v61  ;;  %v3922_v36 = vrot.slane %v1694_v42, %v3719_v63 }
 0x348   : > { %v1613_v29 = vmul.f32 0.2, %v1572_v25  ;;  %2961 = vmatprep.mubr.msk.bf16.mxu1 %vm1013_vm2, %v1669_v22 }
 0x349   : > { %1959 = vmatmul.mubr.bf16.gmra.mrb[88].mxu1 %v1668_v20  ;;  %v1650_v31 = vmax.f32 %v1570_v18, %v1612_v27 }
 0x34a   : > { %v1651_v30 = vmax.f32 %v1572_v25, %v1613_v29 }
 0x34b   : > { %v1670_v33 = vpack.c.bf16 %v1650_v31, %v1650_v31 }
 0x34c   : > { %v1671_v32 = vpack.c.bf16 %v1651_v30, %v1651_v30 }
 0x34e   : > { %2962 = vmatprep.mubr.msk.bf16.mxu1 %vm1013_vm2, %v1671_v32 }
 0x351   : > { %1969 = vmatmul.mubr.bf16.gmra.mrb[92].mxu1 %v1670_v33 }
 0x3dc   : > { %v1880_v37 = vpop.f32.mrb[56].mxu1 }
 0x3dd   : > { %v1881_v38 = vadd.f32 %v1880_v37, %v3919_v35  ;;  %v1882_v39 = vpop.f32.mrb[57].mxu1 }
 0x3de   : > { %v1883_v43 = vadd.f32 %v1882_v39, %v3922_v36  ;;  %v1884_v44 = vpop.f32.mrb[58].mxu1 }
 0x3df   : > { %v1977_v46 = vmul.f32 0.2, %v1881_v38  ;;  %v1885_v47 = vadd.f32 %v1884_v44, %v3919_v35  ;;  %v1886_v48 = vpop.f32.mrb[59].mxu1 }
 0x3e0   : > { %v1978_v49 = vmul.f32 0.2, %v1883_v43  ;;  %v1887_v50 = vadd.f32 %v1886_v48, %v3922_v36 }
 0x3e1   : > { %v1979_v51 = vmul.f32 0.2, %v1885_v47  ;;  %v2015_v54 = vmax.f32 %v1881_v38, %v1977_v46 }
 0x3e2   : > { %v1980_v52 = vmul.f32 0.2, %v1887_v50  ;;  %v2016_v57 = vmax.f32 %v1883_v43, %v1978_v49 }
 0x3e3   : > { %v2017_v56 = vmax.f32 %v1885_v47, %v1979_v51 }
 0x3e4   : > { %v2018_v0 = vmax.f32 %v1887_v50, %v1980_v52  ;;  %v1890_v1 = vpop.f32.mrb[60].mxu1 }
 0x3e5   : > { %v2053_v58 = vpack.c.bf16 %v2017_v56, %v2015_v54  ;;  %v1891_v62 = vadd.f32 %v1890_v1, %v3919_v35  ;;  %v1892_v2 = vpop.f32.mrb[61].mxu1 }
 0x3e6   : > { %v2054_v41 = vpack.c.bf16 %v2018_v0, %v2016_v57  ;;  %v1893_v45 = vadd.f32 %v1892_v2, %v3922_v36  ;;  %v1894_v21 = vpop.f32.mrb[62].mxu1 }
 0x3e7   : > { %v1981_v17 = vmul.f32 0.2, %v1891_v62  ;;  %v1895_v3 = vadd.f32 %v1894_v21, %v3919_v35  ;;  %v1896_v59 = vpop.f32.mrb[63].mxu1 }
 0x3e8   : > { %v1982_v60 = vmul.f32 0.2, %v1893_v45  ;;  %v1897_v4 = vadd.f32 %v1896_v59, %v3922_v36  ;;  %2985 = vmatprep.mubr.msk.bf16.mxu0 %vm1013_vm2, %v2054_v41 }
 0x3e9   : > { %v1983_v53 = vmul.f32 0.2, %v1895_v3  ;;  %2280 = vmatmul.mubr.bf16.vlgmr.msra.gmra.mrb[64].mxu0 %v2053_v58  ;;  %v2019_v5 = vmax.f32 %v1891_v62, %v1981_v17 }
 0x3ea   : > { %v1984_v55 = vmul.f32 0.2, %v1897_v4  ;;  %v2020_v7 = vmax.f32 %v1893_v45, %v1982_v60 }
 0x3eb   : > { %v2021_v6 = vmax.f32 %v1895_v3, %v1983_v53 }
 0x3ec   : > { %v2022_v8 = vmax.f32 %v1897_v4, %v1984_v55  ;;  %v1900_v9 = vpop.f32.mrb[64].mxu1 }
 0x3ed   : > { %v1901_v10 = vadd.f32 %v1900_v9, %v3919_v35  ;;  %v1902_v11 = vpop.f32.mrb[65].mxu1  ;;  %v2055_v12 = vpack.c.bf16 %v2021_v6, %v2019_v5 }
 0x3ee   : > { %v2056_v13 = vpack.c.bf16 %v2022_v8, %v2020_v7  ;;  %v1903_v14 = vadd.f32 %v1902_v11, %v3922_v36  ;;  %v1904_v23 = vpop.f32.mrb[66].mxu1 }
 0x3ef   : > { %v1985_v15 = vmul.f32 0.2, %v1901_v10  ;;  %v1905_v16 = vadd.f32 %v1904_v23, %v3919_v35  ;;  %v1906_v24 = vpop.f32.mrb[67].mxu1 }
 0x3f0   : > { %v1986_v18 = vmul.f32 0.2, %v1903_v14  ;;  %v1907_v19 = vadd.f32 %v1906_v24, %v3922_v36  ;;  %2986 = vmatprep.mubr.msk.bf16.mxu0 %vm1013_vm2, %v2056_v13 }
 0x3f1   : > { %v1987_v20 = vmul.f32 0.2, %v1905_v16  ;;  %2290 = vmatmul.mubr.bf16.gmra.mrb[68].mxu0 %v2055_v12  ;;  %v2023_v25 = vmax.f32 %v1901_v10, %v1985_v15 }
 0x3f2   : > { %v1988_v22 = vmul.f32 0.2, %v1907_v19  ;;  %v2024_v27 = vmax.f32 %v1903_v14, %v1986_v18 }
 0x3f3   : > { %v2025_v26 = vmax.f32 %v1905_v16, %v1987_v20 }
 0x3f4   : > { %v2026_v28 = vmax.f32 %v1907_v19, %v1988_v22  ;;  %v1910_v29 = vpop.f32.mrb[68].mxu1 }
 0x3f5   : > { %v1911_v30 = vadd.f32 %v1910_v29, %v3919_v35  ;;  %v1912_v31 = vpop.f32.mrb[69].mxu1  ;;  %v2057_v32 = vpack.c.bf16 %v2025_v26, %v2023_v25 }
 0x3f6   : > { %v2058_v33 = vpack.c.bf16 %v2026_v28, %v2024_v27  ;;  %v1913_v40 = vadd.f32 %v1912_v31, %v3922_v36  ;;  %v1914_v34 = vpop.f32.mrb[70].mxu1 }
 0x3f7   : > { %v1989_v42 = vmul.f32 0.2, %v1911_v30  ;;  %v1915_v37 = vadd.f32 %v1914_v34, %v3919_v35  ;;  %v1916_v38 = vpop.f32.mrb[71].mxu1 }
 0x3f8   : > { %v1990_v39 = vmul.f32 0.2, %v1913_v40  ;;  %v1917_v43 = vadd.f32 %v1916_v38, %v3922_v36  ;;  %2987 = vmatprep.mubr.msk.bf16.mxu0 %vm1013_vm2, %v2058_v33 }
 0x3f9   : > { %v1991_v44 = vmul.f32 0.2, %v1915_v37  ;;  %2300 = vmatmul.mubr.bf16.gmra.mrb[72].mxu0 %v2057_v32  ;;  %v2027_v47 = vmax.f32 %v1911_v30, %v1989_v42 }
 0x3fa   : > { %v1992_v46 = vmul.f32 0.2, %v1917_v43  ;;  %v2028_v49 = vmax.f32 %v1913_v40, %v1990_v39 }
 0x3fb   : > { %v2029_v48 = vmax.f32 %v1915_v37, %v1991_v44 }
 0x3fc   : > { %v2030_v50 = vmax.f32 %v1917_v43, %v1992_v46  ;;  %v1920_v51 = vpop.f32.mrb[72].mxu1 }
 0x3fd   : > { %v1921_v52 = vadd.f32 %v1920_v51, %v3919_v35  ;;  %v1922_v54 = vpop.f32.mrb[73].mxu1  ;;  %v2059_v56 = vpack.c.bf16 %v2029_v48, %v2027_v47 }
 0x3fe   : > { %v2060_v57 = vpack.c.bf16 %v2030_v50, %v2028_v49  ;;  %v1923_v0 = vadd.f32 %v1922_v54, %v3922_v36  ;;  %v1924_v1 = vpop.f32.mrb[74].mxu1 }
 0x3ff   : > { %v1993_v58 = vmul.f32 0.2, %v1921_v52  ;;  %v1925_v62 = vadd.f32 %v1924_v1, %v3919_v35  ;;  %v1926_v2 = vpop.f32.mrb[75].mxu1 }
 0x400   : > { %v1994_v41 = vmul.f32 0.2, %v1923_v0  ;;  %v1927_v45 = vadd.f32 %v1926_v2, %v3922_v36  ;;  %2988 = vmatprep.mubr.msk.bf16.mxu0 %vm1013_vm2, %v2060_v57 }
 0x401   : > { %v1995_v21 = vmul.f32 0.2, %v1925_v62  ;;  %2310 = vmatmul.mubr.bf16.gmra.mrb[76].mxu0 %v2059_v56  ;;  %v2031_v3 = vmax.f32 %v1921_v52, %v1993_v58 }
 0x402   : > { %v1996_v17 = vmul.f32 0.2, %v1927_v45  ;;  %v2032_v60 = vmax.f32 %v1923_v0, %v1994_v41 }
 0x403   : > { %v2033_v59 = vmax.f32 %v1925_v62, %v1995_v21 }
 0x404   : > { %v2034_v4 = vmax.f32 %v1927_v45, %v1996_v17  ;;  %v1930_v53 = vpop.f32.mrb[76].mxu1 }
 0x405   : > { %v1931_v55 = vadd.f32 %v1930_v53, %v3919_v35  ;;  %v1932_v5 = vpop.f32.mrb[77].mxu1  ;;  %v2061_v6 = vpack.c.bf16 %v2033_v59, %v2031_v3 }
 0x406   : > { %v2062_v7 = vpack.c.bf16 %v2034_v4, %v2032_v60  ;;  %v1933_v8 = vadd.f32 %v1932_v5, %v3922_v36  ;;  %v1934_v9 = vpop.f32.mrb[78].mxu1 }
 0x407   : > { %v1997_v10 = vmul.f32 0.2, %v1931_v55  ;;  %v1935_v11 = vadd.f32 %v1934_v9, %v3919_v35  ;;  %v1936_v12 = vpop.f32.mrb[79].mxu1 }
 0x408   : > { %v1998_v13 = vmul.f32 0.2, %v1933_v8  ;;  %v1937_v14 = vadd.f32 %v1936_v12, %v3922_v36  ;;  %2989 = vmatprep.mubr.msk.bf16.mxu0 %vm1013_vm2, %v2062_v7 }
 0x409   : > { %v1999_v23 = vmul.f32 0.2, %v1935_v11  ;;  %2320 = vmatmul.mubr.bf16.gmra.mrb[80].mxu0 %v2061_v6  ;;  %v2035_v16 = vmax.f32 %v1931_v55, %v1997_v10 }
 0x40a   : > { %v2000_v15 = vmul.f32 0.2, %v1937_v14  ;;  %v2036_v18 = vmax.f32 %v1933_v8, %v1998_v13 }
 0x40b   : > { %v2037_v24 = vmax.f32 %v1935_v11, %v1999_v23 }
 0x40c   : > { %v2038_v19 = vmax.f32 %v1937_v14, %v2000_v15  ;;  %v1940_v20 = vpop.f32.mrb[80].mxu1 }
 0x40d   : > { %v1941_v22 = vadd.f32 %v1940_v20, %v3919_v35  ;;  %v1942_v25 = vpop.f32.mrb[81].mxu1  ;;  %v2063_v26 = vpack.c.bf16 %v2037_v24, %v2035_v16 }
 0x40e   : > { %v2064_v27 = vpack.c.bf16 %v2038_v19, %v2036_v18  ;;  %v1943_v28 = vadd.f32 %v1942_v25, %v3922_v36  ;;  %v1944_v29 = vpop.f32.mrb[82].mxu1 }
 0x40f   : > { %v2001_v30 = vmul.f32 0.2, %v1941_v22  ;;  %v1945_v31 = vadd.f32 %v1944_v29, %v3919_v35  ;;  %v1946_v32 = vpop.f32.mrb[83].mxu1 }
 0x410   : > { %v2002_v33 = vmul.f32 0.2, %v1943_v28  ;;  %v1947_v40 = vadd.f32 %v1946_v32, %v3922_v36  ;;  %2990 = vmatprep.mubr.msk.bf16.mxu0 %vm1013_vm2, %v2064_v27 }
 0x411   : > { %v2003_v34 = vmul.f32 0.2, %v1945_v31  ;;  %2330 = vmatmul.mubr.bf16.gmra.mrb[84].mxu0 %v2063_v26  ;;  %v2039_v37 = vmax.f32 %v1941_v22, %v2001_v30 }
 0x412   : > { %v2004_v42 = vmul.f32 0.2, %v1947_v40  ;;  %v2040_v39 = vmax.f32 %v1943_v28, %v2002_v33 }
 0x413   : > { %v2041_v38 = vmax.f32 %v1945_v31, %v2003_v34  ;;  %v2454_v34 = vld [vmem:[%s4164_s11] sm:$0x3] }
 0x414   : > { %v2042_v43 = vmax.f32 %v1947_v40, %v2004_v42  ;;  %v1950_v44 = vpop.f32.mrb[84].mxu1 }
 0x415   : > { %v1951_v46 = vadd.f32 %v1950_v44, %v3919_v35  ;;  %v1952_v47 = vpop.f32.mrb[85].mxu1  ;;  %v2065_v48 = vpack.c.bf16 %v2041_v38, %v2039_v37 }
 0x416   : > { %v2066_v49 = vpack.c.bf16 %v2042_v43, %v2040_v39  ;;  %v1953_v50 = vadd.f32 %v1952_v47, %v3922_v36  ;;  %v1954_v51 = vpop.f32.mrb[86].mxu1  ;;  %v3989_v47 = vrot.slane %v2454_v34, %v3719_v63 }
 0x417   : > { %v2005_v52 = vmul.f32 0.2, %v1951_v46  ;;  %v1955_v54 = vadd.f32 %v1954_v51, %v3919_v35  ;;  %v1956_v56 = vpop.f32.mrb[87].mxu1 }
 0x418   : > { %v2006_v57 = vmul.f32 0.2, %v1953_v50  ;;  %v1957_v0 = vadd.f32 %v1956_v56, %v3922_v36  ;;  %2991 = vmatprep.mubr.msk.bf16.mxu0 %vm1013_vm2, %v2066_v49 }
 0x419   : > { %v2007_v1 = vmul.f32 0.2, %v1955_v54  ;;  %2340 = vmatmul.mubr.bf16.gmra.mrb[88].mxu0 %v2065_v48  ;;  %v2043_v62 = vmax.f32 %v1951_v46, %v2005_v52 }
 0x41a   : > { %v2008_v58 = vmul.f32 0.2, %v1957_v0  ;;  %v2044_v41 = vmax.f32 %v1953_v50, %v2006_v57  ;;  %v3992_v50 = vrot.slane %v2454_v34, %v3714_v61 }
 0x41b   : > { %v2045_v2 = vmax.f32 %v1955_v54, %v2007_v1 }
 0x41c   : > { %v2046_v45 = vmax.f32 %v1957_v0, %v2008_v58  ;;  %v1960_v21 = vpop.f32.mrb[88].mxu1 }
 0x41d   : > { %v1961_v17 = vadd.f32 %v1960_v21, %v3919_v35  ;;  %v1962_v3 = vpop.f32.mrb[89].mxu1  ;;  %v2067_v59 = vpack.c.bf16 %v2045_v2, %v2043_v62 }
 0x41e   : > { %v2068_v60 = vpack.c.bf16 %v2046_v45, %v2044_v41  ;;  %v1963_v4 = vadd.f32 %v1962_v3, %v3922_v36  ;;  %v1964_v53 = vpop.f32.mrb[90].mxu1 }
 0x41f   : > { %v2009_v55 = vmul.f32 0.2, %v1961_v17  ;;  %v1965_v5 = vadd.f32 %v1964_v53, %v3919_v35  ;;  %v1966_v6 = vpop.f32.mrb[91].mxu1 }
 0x420   : > { %v2010_v7 = vmul.f32 0.2, %v1963_v4  ;;  %v1967_v8 = vadd.f32 %v1966_v6, %v3922_v36  ;;  %2992 = vmatprep.mubr.msk.bf16.mxu0 %vm1013_vm2, %v2068_v60 }
 0x421   : > { %v2011_v9 = vmul.f32 0.2, %v1965_v5  ;;  %2350 = vmatmul.mubr.bf16.gmra.mrb[92].mxu0 %v2067_v59  ;;  %v2047_v11 = vmax.f32 %v1961_v17, %v2009_v55 }
 0x422   : > { %v2012_v10 = vmul.f32 0.2, %v1967_v8  ;;  %v2048_v13 = vmax.f32 %v1963_v4, %v2010_v7 }
 0x423   : > { %v2049_v12 = vmax.f32 %v1965_v5, %v2011_v9 }
 0x424   : > { %v2050_v14 = vmax.f32 %v1967_v8, %v2012_v10  ;;  %v1970_v23 = vpop.f32.mrb[92].mxu1 }
 0x425   : > { %v1971_v15 = vadd.f32 %v1970_v23, %v3919_v35  ;;  %v1972_v16 = vpop.f32.mrb[93].mxu1  ;;  %v2069_v24 = vpack.c.bf16 %v2049_v12, %v2047_v11  ;;  %v2095_v35 = vld [vmem:[%s4163_s10] sm:$0x3] }
 0x426   : > { %v2070_v18 = vpack.c.bf16 %v2050_v14, %v2048_v13  ;;  %v1973_v19 = vadd.f32 %v1972_v16, %v3922_v36  ;;  %v1974_v20 = vpop.f32.mrb[94].mxu1  ;;  %v3976_v36 = vrot.slane %v2095_v35, %v3714_v61  ;;  %v3979_v31 = vrot.slane %v2095_v35, %v3719_v63 }
 0x427   : > { %v2013_v22 = vmul.f32 0.2, %v1971_v15  ;;  %v1975_v25 = vpop.f32.mrb[95].mxu1 }
 0x428   : > { %v2014_v26 = vmul.f32 0.2, %v1973_v19  ;;  %2993 = vmatprep.mubr.msk.bf16.mxu0 %vm1013_vm2, %v2070_v18 }
 0x429   : > { %2360 = vmatmul.mubr.bf16.gmra.mrb[96].mxu0 %v2069_v24  ;;  %v2051_v28 = vmax.f32 %v1971_v15, %v2013_v22 }
 0x42a   : > { %v2052_v27 = vmax.f32 %v1973_v19, %v2014_v26 }
 0x42b   : > { %v2071_v30 = vpack.c.bf16 %v2051_v28, %v2051_v28 }
 0x42c   : > { %v2072_v29 = vpack.c.bf16 %v2052_v27, %v2052_v27 }
 0x42e   : > { %2994 = vmatprep.mubr.msk.bf16.mxu0 %vm1013_vm2, %v2072_v29 }
 0x431   : > { %2370 = vmatmul.mubr.bf16.gmra.mrb[100].mxu0 %v2071_v30 }
 0x4bc   : > { %v2281_v32 = vpop.f32.mrb[64].mxu0 }
 0x4bd   : > { %v2282_v33 = vadd.f32 %v2281_v32, %v3976_v36  ;;  %v2283_v40 = vpop.f32.mrb[65].mxu0 }
 0x4be   : > { %v2284_v42 = vadd.f32 %v2283_v40, %v3979_v31  ;;  %v2285_v37 = vpop.f32.mrb[66].mxu0 }
 0x4bf   : > { %v2378_v38 = vmul.f32 0.2, %v2282_v33  ;;  %v2286_v39 = vadd.f32 %v2285_v37, %v3976_v36  ;;  %v2287_v43 = vpop.f32.mrb[67].mxu0 }
 0x4c0   : > { %v2379_v44 = vmul.f32 0.2, %v2284_v42  ;;  %v2288_v46 = vadd.f32 %v2287_v43, %v3979_v31 }
 0x4c1   : > { %v2416_v48 = vmax.f32 %v2282_v33, %v2378_v38  ;;  %v2380_v49 = vmul.f32 0.2, %v2286_v39 }
 0x4c2   : > { %v2417_v51 = vmax.f32 %v2284_v42, %v2379_v44  ;;  %v2381_v52 = vmul.f32 0.2, %v2288_v46 }
 0x4c3   : > { %v2418_v54 = vmax.f32 %v2286_v39, %v2380_v49  ;;  %v2466_v62 = vmul.f32 %v3992_v50, %v2416_v48 }
 0x4c4   : > { %v2419_v56 = vmax.f32 %v2288_v46, %v2381_v52  ;;  %v2291_v57 = vpop.f32.mrb[68].mxu0  ;;  %v2467_v0 = vmul.f32 %v3989_v47, %v2417_v51 }
 0x4c5   : > { %v2292_v1 = vadd.f32 %v2291_v57, %v3976_v36  ;;  %v2293_v58 = vpop.f32.mrb[69].mxu0  ;;  %v2468_v59 = vmul.f32 %v3992_v50, %v2418_v54 }
 0x4c6   : > { %v2294_v63 = vadd.f32 %v2293_v58, %v3979_v31  ;;  %v2295_v2 = vpop.f32.mrb[70].mxu0  ;;  %v2504_v41 = vsel %vm1013_vm2, %v2467_v0, 0.0  ;;  %v2469_v61 = vmul.f32 %v3989_v47, %v2419_v56 }
 0x4c7   : > { %v2382_v45 = vmul.f32 0.2, %v2292_v1  ;;  %v2296_v21 = vadd.f32 %v2295_v2, %v3976_v36  ;;  %v2297_v17 = vpop.f32.mrb[71].mxu0  ;;  %v2505_v3 = vadd.f32 %v2504_v41, %v2466_v62 }
 0x4c8   : > { %v2383_v60 = vmul.f32 0.2, %v2294_v63  ;;  %v2298_v4 = vadd.f32 %v2297_v17, %v3979_v31  ;;  %v2508_v53 = vsel %vm1013_vm2, %v2469_v61, 0.0 }
 0x4c9   : > { %v2420_v55 = vmax.f32 %v2292_v1, %v2382_v45  ;;  %v2384_v5 = vmul.f32 0.2, %v2296_v21  ;;  %2506 = vadd.xlane.f32.xlu0 %v2505_v3  ;;  %v2509_v6 = vadd.f32 %v2508_v53, %v2468_v59 }
 0x4ca   : > { %v2421_v7 = vmax.f32 %v2294_v63, %v2383_v60  ;;  %v2385_v8 = vmul.f32 0.2, %v2298_v4 }
 0x4cb   : > { %v2422_v9 = vmax.f32 %v2296_v21, %v2384_v5  ;;  %v2470_v23 = vmul.f32 %v3992_v50, %v2420_v55 }
 0x4cc   : > { %v2423_v10 = vmax.f32 %v2298_v4, %v2385_v8  ;;  %v2301_v11 = vpop.f32.mrb[72].mxu0  ;;  %v2471_v12 = vmul.f32 %v3989_v47, %v2421_v7 }
 0x4cd   : > { %v2302_v13 = vadd.f32 %v2301_v11, %v3976_v36  ;;  %v2303_v14 = vpop.f32.mrb[73].mxu0  ;;  %2510 = vadd.xlane.f32.xlu0 %v2509_v6  ;;  %v2472_v26 = vmul.f32 %v3992_v50, %v2422_v9 }
 0x4ce   : > { %v2304_v15 = vadd.f32 %v2303_v14, %v3979_v31  ;;  %v2305_v16 = vpop.f32.mrb[74].mxu0  ;;  %v2512_v24 = vsel %vm1013_vm2, %v2471_v12, 0.0  ;;  %v2473_v18 = vmul.f32 %v3989_v47, %v2423_v10 }
 0x4cf   : > { %v2386_v19 = vmul.f32 0.2, %v2302_v13  ;;  %v2306_v20 = vadd.f32 %v2305_v16, %v3976_v36  ;;  %v2307_v22 = vpop.f32.mrb[75].mxu0  ;;  %v2513_v25 = vadd.f32 %v2512_v24, %v2470_v23 }
 0x4d0   : > { %v2387_v27 = vmul.f32 0.2, %v2304_v15  ;;  %v2308_v28 = vadd.f32 %v2307_v22, %v3979_v31  ;;  %v2516_v29 = vsel %vm1013_vm2, %v2473_v18, 0.0 }
 0x4d1   : > { %v2424_v30 = vmax.f32 %v2302_v13, %v2386_v19  ;;  %v2388_v35 = vmul.f32 0.2, %v2306_v20  ;;  %2514 = vadd.xlane.f32.xlu1 %v2513_v25  ;;  %v2517_v32 = vadd.f32 %v2516_v29, %v2472_v26 }
 0x4d2   : > { %v2425_v33 = vmax.f32 %v2304_v15, %v2387_v27  ;;  %v2389_v40 = vmul.f32 0.2, %v2308_v28 }
 0x4d3   : > { %v2426_v34 = vmax.f32 %v2306_v20, %v2388_v35  ;;  %v2474_v44 = vmul.f32 %v3992_v50, %v2424_v30 }
 0x4d4   : > { %v2427_v42 = vmax.f32 %v2308_v28, %v2389_v40  ;;  %v2311_v37 = vpop.f32.mrb[76].mxu0  ;;  %v2475_v38 = vmul.f32 %v3989_v47, %v2425_v33 }
 0x4d5   : > { %v2312_v39 = vadd.f32 %v2311_v37, %v3976_v36  ;;  %v2313_v43 = vpop.f32.mrb[77].mxu0  ;;  %2518 = vadd.xlane.f32.xlu1 %v2517_v32  ;;  %v2476_v0 = vmul.f32 %v3992_v50, %v2426_v34 }
 0x4d6   : > { %v2314_v46 = vadd.f32 %v2313_v43, %v3979_v31  ;;  %v2315_v48 = vpop.f32.mrb[78].mxu0  ;;  %v2520_v49 = vsel %vm1013_vm2, %v2475_v38, 0.0  ;;  %v2477_v51 = vmul.f32 %v3989_v47, %v2427_v42 }
 0x4d7   : > { %v2390_v52 = vmul.f32 0.2, %v2312_v39  ;;  %v2316_v54 = vadd.f32 %v2315_v48, %v3976_v36  ;;  %v2317_v56 = vpop.f32.mrb[79].mxu0  ;;  %v2521_v57 = vadd.f32 %v2520_v49, %v2474_v44 }
 0x4d8   : > { %v2391_v1 = vmul.f32 0.2, %v2314_v46  ;;  %v2318_v58 = vadd.f32 %v2317_v56, %v3979_v31  ;;  %v2524_v62 = vsel %vm1013_vm2, %v2477_v51, 0.0 }
 0x4d9   : > { %v2428_v63 = vmax.f32 %v2312_v39, %v2390_v52  ;;  %v2392_v2 = vmul.f32 0.2, %v2316_v54  ;;  %2522 = vadd.xlane.f32.xlu0 %v2521_v57  ;;  %v2525_v41 = vadd.f32 %v2524_v62, %v2476_v0 }
 0x4da   : > { %v2429_v61 = vmax.f32 %v2314_v46, %v2391_v1  ;;  %v2393_v45 = vmul.f32 0.2, %v2318_v58 }
 0x4db   : > { %v2430_v21 = vmax.f32 %v2316_v54, %v2392_v2  ;;  %2526 = vadd.xlane.f32.xlu1 %v2525_v41  ;;  %v2478_v53 = vmul.f32 %v3992_v50, %v2428_v63 }
 0x4dc   : > { %v2431_v17 = vmax.f32 %v2318_v58, %v2393_v45  ;;  %v2321_v3 = vpop.f32.mrb[80].mxu0  ;;  %v2479_v59 = vmul.f32 %v3989_v47, %v2429_v61 }
 0x4dd   : > { %v2322_v60 = vadd.f32 %v2321_v3, %v3976_v36  ;;  %v2323_v4 = vpop.f32.mrb[81].mxu0  ;;  %v2480_v12 = vmul.f32 %v3992_v50, %v2430_v21 }
 0x4de   : > { %v2324_v55 = vadd.f32 %v2323_v4, %v3979_v31  ;;  %v2325_v5 = vpop.f32.mrb[82].mxu0  ;;  %v2528_v6 = vsel %vm1013_vm2, %v2479_v59, 0.0  ;;  %v2481_v7 = vmul.f32 %v3989_v47, %v2431_v17 }
 0x4df   : > { %v2394_v8 = vmul.f32 0.2, %v2322_v60  ;;  %v2326_v9 = vadd.f32 %v2325_v5, %v3976_v36  ;;  %v2327_v10 = vpop.f32.mrb[83].mxu0  ;;  %v2529_v11 = vadd.f32 %v2528_v6, %v2478_v53 }
 0x4e0   : > { %v2395_v13 = vmul.f32 0.2, %v2324_v55  ;;  %v2328_v14 = vadd.f32 %v2327_v10, %v3979_v31  ;;  %v2532_v23 = vsel %vm1013_vm2, %v2481_v7, 0.0 }
 0x4e1   : > { %v2432_v15 = vmax.f32 %v2322_v60, %v2394_v8  ;;  %v2396_v16 = vmul.f32 0.2, %v2326_v9  ;;  %2530 = vadd.xlane.f32.xlu0 %v2529_v11  ;;  %v2533_v24 = vadd.f32 %v2532_v23, %v2480_v12 }
 0x4e2   : > { %v2433_v18 = vmax.f32 %v2324_v55, %v2395_v13  ;;  %v2397_v19 = vmul.f32 0.2, %v2328_v14 }
 0x4e3   : > { %v2434_v20 = vmax.f32 %v2326_v9, %v2396_v16  ;;  %2534 = vadd.xlane.f32.xlu1 %v2533_v24  ;;  %v2482_v29 = vmul.f32 %v3992_v50, %v2432_v15 }
 0x4e4   : > { %v2435_v22 = vmax.f32 %v2328_v14, %v2397_v19  ;;  %v2331_v25 = vpop.f32.mrb[84].mxu0  ;;  %v2483_v26 = vmul.f32 %v3989_v47, %v2433_v18 }
 0x4e5   : > { %v2332_v27 = vadd.f32 %v2331_v25, %v3976_v36  ;;  %v2333_v28 = vpop.f32.mrb[85].mxu0  ;;  %v2484_v38 = vmul.f32 %v3992_v50, %v2434_v20 }
 0x4e6   : > { %v2334_v30 = vadd.f32 %v2333_v28, %v3979_v31  ;;  %v2335_v35 = vpop.f32.mrb[86].mxu0  ;;  %v2536_v32 = vsel %vm1013_vm2, %v2483_v26, 0.0  ;;  %v2485_v33 = vmul.f32 %v3989_v47, %v2435_v22 }
 0x4e7   : > { %v2398_v40 = vmul.f32 0.2, %v2332_v27  ;;  %v2336_v34 = vadd.f32 %v2335_v35, %v3976_v36  ;;  %v2337_v42 = vpop.f32.mrb[87].mxu0  ;;  %v2537_v37 = vadd.f32 %v2536_v32, %v2482_v29 }
 0x4e8   : > { %v2399_v39 = vmul.f32 0.2, %v2334_v30  ;;  %v2338_v43 = vadd.f32 %v2337_v42, %v3979_v31  ;;  %v2540_v44 = vsel %vm1013_vm2, %v2485_v33, 0.0 }
 0x4e9   : > { %v2436_v46 = vmax.f32 %v2332_v27, %v2398_v40  ;;  %v2400_v48 = vmul.f32 0.2, %v2336_v34  ;;  %2538 = vadd.xlane.f32.xlu0 %v2537_v37  ;;  %v2541_v49 = vadd.f32 %v2540_v44, %v2484_v38 }
 0x4ea   : > { %v2437_v51 = vmax.f32 %v2334_v30, %v2399_v39  ;;  %v2401_v52 = vmul.f32 0.2, %v2338_v43 }
 0x4eb   : > { %v2438_v54 = vmax.f32 %v2336_v34, %v2400_v48  ;;  %2542 = vadd.xlane.f32.xlu1 %v2541_v49  ;;  %v2486_v62 = vmul.f32 %v3992_v50, %v2436_v46 }
 0x4ec   : > { %v2439_v56 = vmax.f32 %v2338_v43, %v2401_v52  ;;  %v2341_v57 = vpop.f32.mrb[88].mxu0  ;;  %v2487_v0 = vmul.f32 %v3989_v47, %v2437_v51 }
 0x4ed   : > { %v2342_v1 = vadd.f32 %v2341_v57, %v3976_v36  ;;  %v2343_v58 = vpop.f32.mrb[89].mxu0  ;;  %v2488_v59 = vmul.f32 %v3992_v50, %v2438_v54 }
 0x4ee   : > { %v2344_v63 = vadd.f32 %v2343_v58, %v3979_v31  ;;  %v2345_v2 = vpop.f32.mrb[90].mxu0  ;;  %v2544_v41 = vsel %vm1013_vm2, %v2487_v0, 0.0  ;;  %v2489_v61 = vmul.f32 %v3989_v47, %v2439_v56 }
 0x4ef   : > { %v2402_v45 = vmul.f32 0.2, %v2342_v1  ;;  %v2346_v21 = vadd.f32 %v2345_v2, %v3976_v36  ;;  %v2347_v17 = vpop.f32.mrb[91].mxu0  ;;  %v2545_v3 = vadd.f32 %v2544_v41, %v2486_v62 }
 0x4f0   : > { %v2403_v60 = vmul.f32 0.2, %v2344_v63  ;;  %v2348_v4 = vadd.f32 %v2347_v17, %v3979_v31  ;;  %v2548_v53 = vsel %vm1013_vm2, %v2489_v61, 0.0 }
 0x4f1   : > { %v2440_v55 = vmax.f32 %v2342_v1, %v2402_v45  ;;  %v2404_v5 = vmul.f32 0.2, %v2346_v21  ;;  %2546 = vadd.xlane.f32.xlu0 %v2545_v3  ;;  %v2549_v6 = vadd.f32 %v2548_v53, %v2488_v59 }
 0x4f2   : > { %v2441_v7 = vmax.f32 %v2344_v63, %v2403_v60  ;;  %v2405_v8 = vmul.f32 0.2, %v2348_v4 }
 0x4f3   : > { %v2442_v9 = vmax.f32 %v2346_v21, %v2404_v5  ;;  %2550 = vadd.xlane.f32.xlu1 %v2549_v6  ;;  %v2490_v23 = vmul.f32 %v3992_v50, %v2440_v55 }
 0x4f4   : > { %v2443_v10 = vmax.f32 %v2348_v4, %v2405_v8  ;;  %v2351_v11 = vpop.f32.mrb[92].mxu0  ;;  %v2491_v12 = vmul.f32 %v3989_v47, %v2441_v7 }
 0x4f5   : > { %v2352_v13 = vadd.f32 %v2351_v11, %v3976_v36  ;;  %v2353_v14 = vpop.f32.mrb[93].mxu0  ;;  %v2492_v26 = vmul.f32 %v3992_v50, %v2442_v9 }
 0x4f6   : > { %v2354_v15 = vadd.f32 %v2353_v14, %v3979_v31  ;;  %v2355_v16 = vpop.f32.mrb[94].mxu0  ;;  %v2552_v24 = vsel %vm1013_vm2, %v2491_v12, 0.0  ;;  %v2493_v18 = vmul.f32 %v3989_v47, %v2443_v10 }
 0x4f7   : > { %v2406_v19 = vmul.f32 0.2, %v2352_v13  ;;  %v2356_v20 = vadd.f32 %v2355_v16, %v3976_v36  ;;  %v2357_v22 = vpop.f32.mrb[95].mxu0  ;;  %v2553_v25 = vadd.f32 %v2552_v24, %v2490_v23 }
 0x4f8   : > { %v2407_v27 = vmul.f32 0.2, %v2354_v15  ;;  %v2358_v28 = vadd.f32 %v2357_v22, %v3979_v31  ;;  %v2556_v29 = vsel %vm1013_vm2, %v2493_v18, 0.0  ;;  %v4085_v18 = vld [vmem:[#allocation2] ss:$0 sm:$0xff] }
 0x4f9   : > { %v2444_v30 = vmax.f32 %v2352_v13, %v2406_v19  ;;  %v2408_v35 = vmul.f32 0.2, %v2356_v20  ;;  %2554 = vadd.xlane.f32.xlu0 %v2553_v25  ;;  %v2557_v32 = vadd.f32 %v2556_v29, %v2492_v26 }
 0x4fa   : > { %v2445_v33 = vmax.f32 %v2354_v15, %v2407_v27  ;;  %v2409_v40 = vmul.f32 0.2, %v2358_v28 }
 0x4fb   : > { %v2446_v34 = vmax.f32 %v2356_v20, %v2408_v35  ;;  %2558 = vadd.xlane.f32.xlu1 %v2557_v32  ;;  %v2494_v44 = vmul.f32 %v3992_v50, %v2444_v30 }
 0x4fc   : > { %v2447_v42 = vmax.f32 %v2358_v28, %v2409_v40  ;;  %v2361_v37 = vpop.f32.mrb[96].mxu0  ;;  %v2495_v38 = vmul.f32 %v3989_v47, %v2445_v33 }
 0x4fd   : > { %v2362_v39 = vadd.f32 %v2361_v37, %v3976_v36  ;;  %v2363_v43 = vpop.f32.mrb[97].mxu0  ;;  %v2496_v0 = vmul.f32 %v3992_v50, %v2446_v34 }
 0x4fe   : > { %v2364_v46 = vadd.f32 %v2363_v43, %v3979_v31  ;;  %v2365_v48 = vpop.f32.mrb[98].mxu0  ;;  %v2560_v49 = vsel %vm1013_vm2, %v2495_v38, 0.0  ;;  %v2497_v51 = vmul.f32 %v3989_v47, %v2447_v42 }
 0x4ff   : > { %v2410_v52 = vmul.f32 0.2, %v2362_v39  ;;  %v2366_v54 = vadd.f32 %v2365_v48, %v3976_v36  ;;  %v2367_v56 = vpop.f32.mrb[99].mxu0  ;;  %v2561_v57 = vadd.f32 %v2560_v49, %v2494_v44 }
 0x500   : > { %v2411_v1 = vmul.f32 0.2, %v2364_v46  ;;  %v2368_v58 = vadd.f32 %v2367_v56, %v3979_v31  ;;  %v2564_v62 = vsel %vm1013_vm2, %v2497_v51, 0.0 }
 0x501   : > { %v2448_v63 = vmax.f32 %v2362_v39, %v2410_v52  ;;  %v2412_v2 = vmul.f32 0.2, %v2366_v54  ;;  %2562 = vadd.xlane.f32.xlu0 %v2561_v57  ;;  %v2565_v41 = vadd.f32 %v2564_v62, %v2496_v0 }
 0x502   : > { %v2449_v61 = vmax.f32 %v2364_v46, %v2411_v1  ;;  %v2413_v45 = vmul.f32 0.2, %v2368_v58 }
 0x503   : > { %v2450_v21 = vmax.f32 %v2366_v54, %v2412_v2  ;;  %2566 = vadd.xlane.f32.xlu1 %v2565_v41  ;;  %v2498_v53 = vmul.f32 %v3992_v50, %v2448_v63 }
 0x504   : > { %v2451_v17 = vmax.f32 %v2368_v58, %v2413_v45  ;;  %v2371_v3 = vpop.f32.mrb[100].mxu0  ;;  %v2499_v59 = vmul.f32 %v3989_v47, %v2449_v61 }
 0x505   : > { %v2372_v60 = vadd.f32 %v2371_v3, %v3976_v36  ;;  %v2373_v4 = vpop.f32.mrb[101].mxu0  ;;  %v2500_v11 = vmul.f32 %v3992_v50, %v2450_v21 }
 0x506   : > { %v2374_v55 = vadd.f32 %v2373_v4, %v3979_v31  ;;  %v2375_v5 = vpop.f32.mrb[102].mxu0  ;;  %v2568_v6 = vsel %vm1013_vm2, %v2499_v59, 0.0  ;;  %v2501_v7 = vmul.f32 %v3989_v47, %v2451_v17 }
 0x507   : > { %v2414_v8 = vmul.f32 0.2, %v2372_v60  ;;  %v2376_v9 = vpop.f32.mrb[103].mxu0  ;;  %v2569_v10 = vadd.f32 %v2568_v6, %v2498_v53 }
 0x508   : > { %v2415_v12 = vmul.f32 0.2, %v2374_v55  ;;  %v2572_v13 = vsel %vm1013_vm2, %v2501_v7, 0.0 }
 0x509   : > { %v2452_v14 = vmax.f32 %v2372_v60, %v2414_v8  ;;  %2570 = vadd.xlane.f32.xlu0 %v2569_v10  ;;  %v2573_v36 = vadd.f32 %v2572_v13, %v2500_v11 }
 0x50a   : > { %v2453_v23 = vmax.f32 %v2374_v55, %v2415_v12 }
 0x50b   : > { %2574 = vadd.xlane.f32.xlu1 %v2573_v36  ;;  %v2502_v15 = vmul.f32 %v3992_v50, %v2452_v14 }
 0x50c   : > { %v2503_v31 = vmul.f32 %v3989_v47, %v2453_v23 }
 0x50e   : > { %v2576_v16 = vsel %vm1013_vm2, %v2503_v31, 0.0 }
 0x50f   : > { %v2577_v24 = vadd.f32 %v2576_v16, %v2502_v15 }
 0x511   : > { %2578 = vadd.xlane.f32.xlu0 %v2577_v24 }
 0x556   : > { %v2507_v19 = vpop.xlane.xlu0 %2506 }
 0x557   : > { %v2587_v20 = vadd.f32 %v4085_v18, %v2507_v19 }
 0x559   : > { %v2996_v22 = vmul.f32 -1.442695, %v2587_v20 }
 0x55a   : > { %v2511_v25 = vpop.xlane.xlu0 %2510 }
 0x55b   : > { %3216 = vpow2.f32 %v2996_v22  ;;  %v2588_v26 = vadd.f32 %v4085_v18, %v2511_v25 }
 0x55d   : > { %v2997_v27 = vmul.f32 -1.442695, %v2588_v26 }
 0x55e   : > { %v2515_v28 = vpop.xlane.xlu1 %2514 }
 0x55f   : > { %3218 = vpow2.f32 %v2997_v27  ;;  %v2589_v47 = vadd.f32 %v4085_v18, %v2515_v28 }
 0x561   : > { %v2998_v50 = vmul.f32 -1.442695, %v2589_v47 }
 0x562   : > { %v2519_v29 = vpop.xlane.xlu1 %2518 }
 0x563   : > { %3220 = vpow2.f32 %v2998_v50  ;;  %v2590_v30 = vadd.f32 %v4085_v18, %v2519_v29 }
 0x565   : > { %v3217_v35 = vpop.eup %3216  ;;  %v2999_v32 = vmul.f32 -1.442695, %v2590_v30 }
 0x566   : > { %v2663_v33 = vadd.f32 1.0, %v3217_v35  ;;  %v2523_v40 = vpop.xlane.xlu0 %2522 }
 0x567   : > { %3222 = vpow2.f32 %v2999_v32  ;;  %v2591_v34 = vadd.f32 %v4085_v18, %v2523_v40 }
 0x568   : > { %3224 = vrcp.f32 %v2663_v33  ;;  %v2527_v42 = vpop.xlane.xlu1 %2526 }
 0x569   : > { %v3219_v37 = vpop.eup %3218  ;;  %v3000_v38 = vmul.f32 -1.442695, %v2591_v34  ;;  %v2592_v39 = vadd.f32 %v4085_v18, %v2527_v42 }
 0x56a   : > { %v2664_v43 = vadd.f32 1.0, %v3219_v37 }
 0x56b   : > { %3226 = vpow2.f32 %v3000_v38  ;;  %v3001_v44 = vmul.f32 -1.442695, %v2592_v39 }
 0x56c   : > { %3228 = vrcp.f32 %v2664_v43 }
 0x56d   : > { %v3221_v46 = vpop.eup %3220  ;;  %3230 = vpow2.f32 %v3001_v44 }
 0x56e   : > { %v2665_v48 = vadd.f32 1.0, %v3221_v46  ;;  %v2531_v49 = vpop.xlane.xlu0 %2530 }
 0x56f   : > { %v2593_v51 = vadd.f32 %v4085_v18, %v2531_v49 }
 0x570   : > { %3232 = vrcp.f32 %v2665_v48  ;;  %v2535_v52 = vpop.xlane.xlu1 %2534 }
 0x571   : > { %v3223_v54 = vpop.eup %3222  ;;  %v3002_v56 = vmul.f32 -1.442695, %v2593_v51  ;;  %v2594_v57 = vadd.f32 %v4085_v18, %v2535_v52 }
 0x572   : > { %v3225_v0 = vpop.eup %3224  ;;  %v2666_v1 = vadd.f32 1.0, %v3223_v54 }
 0x573   : > { %2721 = vst.msk [vmem:[%s4098_s24] sm:$0xff] %vm2720_vm3, %v3225_v0  ;;  %3234 = vpow2.f32 %v3002_v56  ;;  %v3003_v58 = vmul.f32 -1.442695, %v2594_v57 }
 0x574   : > { %3236 = vrcp.f32 %v2666_v1 }
 0x575   : > { %v3227_v62 = vpop.eup %3226  ;;  %3238 = vpow2.f32 %v3003_v58 }
 0x576   : > { %v3229_v63 = vpop.eup %3228  ;;  %v2667_v2 = vadd.f32 1.0, %v3227_v62  ;;  %v2539_v41 = vpop.xlane.xlu0 %2538 }
 0x577   : > { %v3231_v61 = vpop.eup %3230  ;;  %2722 = vst.msk [vmem:[%s4098_s24 + $0x8] sm:$0xff] %vm2720_vm3, %v3229_v63  ;;  %v2595_v45 = vadd.f32 %v4085_v18, %v2539_v41 }
 0x578   : > { %3240 = vrcp.f32 %v2667_v2  ;;  %v2668_v21 = vadd.f32 1.0, %v3231_v61  ;;  %v2543_v17 = vpop.xlane.xlu1 %2542 }
 0x579   : > { %v3004_v3 = vmul.f32 -1.442695, %v2595_v45  ;;  %v2596_v59 = vadd.f32 %v4085_v18, %v2543_v17 }
 0x57a   : > { %v3233_v60 = vpop.eup %3232  ;;  %3242 = vrcp.f32 %v2668_v21 }
 0x57b   : > { %2723 = vst.msk [vmem:[%s4098_s24 + $0x10] sm:$0xff] %vm2720_vm3, %v3233_v60  ;;  %3244 = vpow2.f32 %v3004_v3  ;;  %v3005_v4 = vmul.f32 -1.442695, %v2596_v59 }
 0x57d   : > { %v3235_v53 = vpop.eup %3234  ;;  %3246 = vpow2.f32 %v3005_v4 }
 0x57e   : > { %v3237_v55 = vpop.eup %3236  ;;  %v2669_v5 = vadd.f32 1.0, %v3235_v53  ;;  %v2547_v6 = vpop.xlane.xlu0 %2546 }
 0x57f   : > { %v3239_v7 = vpop.eup %3238  ;;  %2724 = vst.msk [vmem:[%s4098_s24 + $0x18] sm:$0xff] %vm2720_vm3, %v3237_v55  ;;  %v2597_v8 = vadd.f32 %v4085_v18, %v2547_v6 }
 0x580   : > { %3248 = vrcp.f32 %v2669_v5  ;;  %v2670_v9 = vadd.f32 1.0, %v3239_v7  ;;  %v2551_v10 = vpop.xlane.xlu1 %2550 }
 0x581   : > { %v3006_v11 = vmul.f32 -1.442695, %v2597_v8  ;;  %v2598_v12 = vadd.f32 %v4085_v18, %v2551_v10 }
 0x582   : > { %v3241_v13 = vpop.eup %3240  ;;  %3250 = vrcp.f32 %v2670_v9 }
 0x583   : > { %2725 = vst.msk [vmem:[%s4098_s24 + $0x20] sm:$0xff] %vm2720_vm3, %v3241_v13  ;;  %3252 = vpow2.f32 %v3006_v11  ;;  %v3007_v14 = vmul.f32 -1.442695, %v2598_v12 }
 0x584   : > { %v3243_v36 = vpop.eup %3242 }
 0x585   : > { %v3245_v23 = vpop.eup %3244  ;;  %2726 = vst.msk [vmem:[%s4098_s24 + $0x28] sm:$0xff] %vm2720_vm3, %v3243_v36  ;;  %3254 = vpow2.f32 %v3007_v14 }
 0x586   : > { %v2671_v31 = vadd.f32 1.0, %v3245_v23  ;;  %v2555_v15 = vpop.xlane.xlu0 %2554 }
 0x587   : > { %v3247_v16 = vpop.eup %3246  ;;  %v2599_v24 = vadd.f32 %v4085_v18, %v2555_v15 }
 0x588   : > { %3256 = vrcp.f32 %v2671_v31  ;;  %v2672_v19 = vadd.f32 1.0, %v3247_v16  ;;  %v2559_v20 = vpop.xlane.xlu1 %2558 }
 0x589   : > { %v3008_v22 = vmul.f32 -1.442695, %v2599_v24  ;;  %v2600_v25 = vadd.f32 %v4085_v18, %v2559_v20 }
 0x58a   : > { %v3249_v26 = vpop.eup %3248  ;;  %3258 = vrcp.f32 %v2672_v19 }
 0x58b   : > { %2727 = vst.msk [vmem:[%s4098_s24 + $0x30] sm:$0xff] %vm2720_vm3, %v3249_v26  ;;  %3260 = vpow2.f32 %v3008_v22  ;;  %v3009_v27 = vmul.f32 -1.442695, %v2600_v25 }
 0x58c   : > { %v3251_v28 = vpop.eup %3250 }
 0x58d   : > { %v3253_v47 = vpop.eup %3252  ;;  %2728 = vst.msk [vmem:[%s4098_s24 + $0x38] sm:$0xff] %vm2720_vm3, %v3251_v28  ;;  %3262 = vpow2.f32 %v3009_v27 }
 0x58e   : > { %v2673_v50 = vadd.f32 1.0, %v3253_v47  ;;  %v2563_v29 = vpop.xlane.xlu0 %2562 }
 0x58f   : > { %v3255_v30 = vpop.eup %3254  ;;  %v2601_v35 = vadd.f32 %v4085_v18, %v2563_v29 }
 0x590   : > { %3264 = vrcp.f32 %v2673_v50  ;;  %v2674_v32 = vadd.f32 1.0, %v3255_v30  ;;  %v2567_v33 = vpop.xlane.xlu1 %2566 }
 0x591   : > { %v3010_v40 = vmul.f32 -1.442695, %v2601_v35  ;;  %v2602_v34 = vadd.f32 %v4085_v18, %v2567_v33 }
 0x592   : > { %v3257_v42 = vpop.eup %3256  ;;  %3266 = vrcp.f32 %v2674_v32 }
 0x593   : > { %2729 = vst.msk [vmem:[%s4098_s24 + $0x40] sm:$0xff] %vm2720_vm3, %v3257_v42  ;;  %3268 = vpow2.f32 %v3010_v40  ;;  %v3011_v37 = vmul.f32 -1.442695, %v2602_v34 }
 0x594   : > { %v3259_v38 = vpop.eup %3258 }
 0x595   : > { %v3261_v39 = vpop.eup %3260  ;;  %2730 = vst.msk [vmem:[%s4098_s24 + $0x48] sm:$0xff] %vm2720_vm3, %v3259_v38  ;;  %3270 = vpow2.f32 %v3011_v37 }
 0x596   : > { %v2675_v43 = vadd.f32 1.0, %v3261_v39  ;;  %v2571_v44 = vpop.xlane.xlu0 %2570 }
 0x597   : > { %v3263_v46 = vpop.eup %3262  ;;  %v2603_v48 = vadd.f32 %v4085_v18, %v2571_v44 }
 0x598   : > { %3272 = vrcp.f32 %v2675_v43  ;;  %v2676_v49 = vadd.f32 1.0, %v3263_v46  ;;  %v2575_v51 = vpop.xlane.xlu1 %2574 }
 0x599   : > { %v3012_v52 = vmul.f32 -1.442695, %v2603_v48  ;;  %v2604_v54 = vadd.f32 %v4085_v18, %v2575_v51 }
 0x59a   : > { %v3265_v56 = vpop.eup %3264  ;;  %3274 = vrcp.f32 %v2676_v49 }
 0x59b   : > { %2731 = vst.msk [vmem:[%s4098_s24 + $0x50] sm:$0xff] %vm2720_vm3, %v3265_v56  ;;  %3276 = vpow2.f32 %v3012_v52  ;;  %v3013_v57 = vmul.f32 -1.442695, %v2604_v54 }
 0x59c   : > { %v3267_v0 = vpop.eup %3266 }
 0x59d   : > { %v3269_v1 = vpop.eup %3268  ;;  %2732 = vst.msk [vmem:[%s4098_s24 + $0x58] sm:$0xff] %vm2720_vm3, %v3267_v0  ;;  %3278 = vpow2.f32 %v3013_v57 }
 0x59e   : > { %v2677_v58 = vadd.f32 1.0, %v3269_v1  ;;  %v2579_v62 = vpop.xlane.xlu0 %2578 }
 0x59f   : > { %v3271_v63 = vpop.eup %3270  ;;  %v2605_v2 = vadd.f32 %v4085_v18, %v2579_v62 }
 0x5a0   : > { %3280 = vrcp.f32 %v2677_v58  ;;  %v2678_v41 = vadd.f32 1.0, %v3271_v63 }
 0x5a1   : > { %v3014_v61 = vmul.f32 -1.442695, %v2605_v2 }
 0x5a2   : > { %v3273_v45 = vpop.eup %3272  ;;  %3282 = vrcp.f32 %v2678_v41 }
 0x5a3   : > { %2733 = vst.msk [vmem:[%s4098_s24 + $0x60] sm:$0xff] %vm2720_vm3, %v3273_v45  ;;  %3284 = vpow2.f32 %v3014_v61 }
 0x5a4   : > { %v3275_v21 = vpop.eup %3274 }
 0x5a5   : > { %v3277_v17 = vpop.eup %3276  ;;  %2734 = vst.msk [vmem:[%s4098_s24 + $0x68] sm:$0xff] %vm2720_vm3, %v3275_v21 }
 0x5a6   : > { %v2679_v3 = vadd.f32 1.0, %v3277_v17 }
 0x5a7   : > { %v3279_v59 = vpop.eup %3278 }
 0x5a8   : > { %3286 = vrcp.f32 %v2679_v3  ;;  %v2680_v18 = vadd.f32 1.0, %v3279_v59 }
 0x5aa   : > { %v3281_v60 = vpop.eup %3280  ;;  %3288 = vrcp.f32 %v2680_v18 }
 0x5ab   : > { %2735 = vst.msk [vmem:[%s4098_s24 + $0x70] sm:$0xff] %vm2720_vm3, %v3281_v60 }
 0x5ac   : > { %v3283_v4 = vpop.eup %3282 }
 0x5ad   : > { %v3285_v53 = vpop.eup %3284  ;;  %2736 = vst.msk [vmem:[%s4098_s24 + $0x78] sm:$0xff] %vm2720_vm3, %v3283_v4 }
 0x5ae   : > { %v2681_v55 = vadd.f32 1.0, %v3285_v53 }
 0x5b0   : > { %3290 = vrcp.f32 %v2681_v55 }
 0x5b2   : > { %v3287_v5 = vpop.eup %3286 }
 0x5b3   : > { %2737 = vst.msk [vmem:[%s4098_s24 + $0x80] sm:$0xff] %vm2720_vm3, %v3287_v5 }
 0x5b4   : > { %v3289_v6 = vpop.eup %3288 }
 0x5b5   : > { %2738 = vst.msk [vmem:[%s4098_s24 + $0x88] sm:$0xff] %vm2720_vm3, %v3289_v6 }
 0x5ba   : > { %v3291_v7 = vpop.eup %3290 }
 0x5bb   : > { %2739 = vst.msk [vmem:[%s4098_s24 + $0x90] sm:$0xff] %vm2720_vm3, %v3291_v7 }
 0x5bc PF: > { %s27_s27 = sadd.s32 1, %s3390_s27  }
 0x5bd   : > { %p24_p3 = scmp.ge.s32.totalorder %s27_s27, 4  }
 0x5bf   :  { %26 = sbr.rel (!%p24_p3) target bundleno = 5 (0x5), region = 115 }
 0x5c6   :  { %2762 = vsyncpa [#allocation4], 1 }
 0x5c7   :  { %2764 = vsyncpa [#allocation4 + $0x1], 1 }
 0x5c8   :  { %2765 = vsyncpa [#allocation6], 1 }

</bundles_post_ra>
